<compile_context>
chip_gen: v5e
topology: v5e:2x2
jax: 0.10.0
libtpu: 0.0.40
codegen_flags: <defaults>
</compile_context>

<pallas_src>
import functools

import jax
import jax.numpy as jnp
from jax import lax
from jax.experimental import pallas as pl
from jax.experimental.pallas import tpu as pltpu

TM_DEFAULT = 512                      # row tile for the 1x1 matmul kernels


@functools.lru_cache(maxsize=None)
def _vmem_limit():
    """Scoped-VMEM limit: physical capacity minus headroom, capped at 112 MiB."""
    mib = 1024 * 1024
    phys = 64 * mib
    try:
        info_fn = getattr(pltpu, "get_tpu_info", None)
        if info_fn is not None:
            phys = int(getattr(info_fn(), "vmem_capacity_bytes", phys))
    except Exception:
        pass
    # v7x (64 MiB phys) -> 48 MiB, v5e/v6e (128 MiB phys) -> 112 MiB
    return int(min(112 * mib, max(phys - 16 * mib, phys // 2)))


def _compiler_params(sem=("parallel",)):
    return pltpu.CompilerParams(
        dimension_semantics=sem,
        vmem_limit_bytes=_vmem_limit(),
    )


def _row_tile(m, max_tm=TM_DEFAULT):
    """Full M when small (always legal), otherwise a 512-row tile (mult. of 16/128)."""
    return m if m <= max_tm else max_tm


# ---------------------------------------------------------------------------
# Pallas kernels
# ---------------------------------------------------------------------------
def _mm_bias_kernel(x_ref, w_ref, b_ref, o_ref, *, relu):
    """(tm, K)bf16 @ (K, C)bf16 -> f32 + bias -> optional ReLU -> out dtype."""
    y = jnp.dot(x_ref[...], w_ref[...], preferred_element_type=jnp.float32)
    y = y + b_ref[...]
    if relu:
        y = jnp.maximum(y, 0.0)
    o_ref[...] = y.astype(o_ref.dtype)


def _mm_bias_proj_relu_kernel(x_ref, xs_ref, w_ref, b_ref, ws_ref, bs_ref, o_ref):
    """Fused: conv3(1x1)+bn3  +  projection-shortcut(1x1)+bn_sc  -> add -> ReLU."""
    y = jnp.dot(x_ref[...], w_ref[...], preferred_element_type=jnp.float32) + b_ref[...]
    sc = jnp.dot(xs_ref[...], ws_ref[...], preferred_element_type=jnp.float32) + bs_ref[...]
    o_ref[...] = jnp.maximum(y + sc, 0.0).astype(o_ref.dtype)


def _mm_bias_residual_relu_kernel(x_ref, r_ref, w_ref, b_ref, o_ref):
    """Fused: conv3(1x1)+bn3 + identity residual -> ReLU."""
    y = jnp.dot(x_ref[...], w_ref[...], preferred_element_type=jnp.float32) + b_ref[...]
    y = y + r_ref[...].astype(jnp.float32)
    o_ref[...] = jnp.maximum(y, 0.0).astype(o_ref.dtype)


def _conv3x3_kernel(xph_ref, w_ref, b_ref, o_ref, *, stride, wp, wo, ho, t_ho):
    """3x3 stride-s conv + folded-BN bias + ReLU for one image.

    xph_ref: (1, s*s, Hp*Wp, Cin) phase-decomposed, spatially-flattened padded
             input (bf16).  Tap (dy, dx) of output flat-row r is flat row
             r + (dy//s)*Wp + (dx//s) of phase (dy%s)*s + (dx%s).
    w_ref:   (9, Cin, Cout) bf16, BN scale folded in.
    o_ref:   (1, Ho, Wo, Cout) bf16 -- compact layout, crop fused into stores.

    The image is processed in static row-group tiles of t_ho output rows so the
    f32 accumulator stays small (vreg-resident) and the 9-tap sum is a chained
    accumulate (no whole-image VMEM scratch).
    """
    s = stride
    cout = o_ref.shape[-1]
    for row0 in range(0, ho, t_ho):                     # static (unrolled) tiles
        th = min(t_ho, ho - row0)
        nrows = th * wp
        acc = jnp.zeros((nrows, cout), jnp.float32)
        for dy in range(3):
            for dx in range(3):
                p = (dy % s) * s + (dx % s)
                base = (dy // s) * wp + (dx // s)
                lhs = xph_ref[0, p, pl.ds(row0 * wp + base, nrows), :]
                acc = acc + jnp.dot(lhs, w_ref[dy * 3 + dx, :, :],
                                    preferred_element_type=jnp.float32)
        y = jnp.maximum(acc + b_ref[...], 0.0)          # (nrows, Cout) f32
        # crop the Wp-Wo garbage columns while storing (compact output layout)
        for j in range(th):
            o_ref[0, row0 + j, :, :] = y[j * wp: j * wp + wo, :].astype(o_ref.dtype)
        # TODO(synk): for Cout < 128 these are masked vst.msk stores; a
        # lane-dense repacked output slab could remove that on v6e/v7x.


# ---------------------------------------------------------------------------
# pallas_call wrappers
# ---------------------------------------------------------------------------
def fused_matmul_bias(x2d, w, bias, *, relu, out_dtype):
    m, k = x2d.shape
    c = w.shape[1]
    tm = _row_tile(m)
    return pl.pallas_call(
        functools.partial(_mm_bias_kernel, relu=relu),
        out_shape=jax.ShapeDtypeStruct((m, c), out_dtype),
        grid=(pl.cdiv(m, tm),),
        in_specs=[
            pl.BlockSpec((tm, k), lambda i: (i, 0)),
            pl.BlockSpec((k, c), lambda i: (0, 0)),
            pl.BlockSpec((1, c), lambda i: (0, 0)),
        ],
        out_specs=pl.BlockSpec((tm, c), lambda i: (i, 0)),
        compiler_params=_compiler_params(("parallel",)),
    )(x2d, w, bias)


def fused_conv3_shortcut(x2d, xs2d, w3, b3, wsc, bsc, out_dtype):
    m, k3 = x2d.shape
    ksc = xs2d.shape[1]
    c = w3.shape[1]
    tm = _row_tile(m)
    return pl.pallas_call(
        _mm_bias_proj_relu_kernel,
        out_shape=jax.ShapeDtypeStruct((m, c), out_dtype),
        grid=(pl.cdiv(m, tm),),
        in_specs=[
            pl.BlockSpec((tm, k3), lambda i: (i, 0)),
            pl.BlockSpec((tm, ksc), lambda i: (i, 0)),
            pl.BlockSpec((k3, c), lambda i: (0, 0)),
            pl.BlockSpec((1, c), lambda i: (0, 0)),
            pl.BlockSpec((ksc, c), lambda i: (0, 0)),
            pl.BlockSpec((1, c), lambda i: (0, 0)),
        ],
        out_specs=pl.BlockSpec((tm, c), lambda i: (i, 0)),
        compiler_params=_compiler_params(("parallel",)),
    )(x2d, xs2d, w3, b3, wsc, bsc)


def fused_conv3_identity(x2d, res2d, w3, b3, out_dtype):
    m, k3 = x2d.shape
    c = w3.shape[1]
    tm = _row_tile(m)
    return pl.pallas_call(
        _mm_bias_residual_relu_kernel,
        out_shape=jax.ShapeDtypeStruct((m, c), out_dtype),
        grid=(pl.cdiv(m, tm),),
        in_specs=[
            pl.BlockSpec((tm, k3), lambda i: (i, 0)),
            pl.BlockSpec((tm, c), lambda i: (i, 0)),
            pl.BlockSpec((k3, c), lambda i: (0, 0)),
            pl.BlockSpec((1, c), lambda i: (0, 0)),
        ],
        out_specs=pl.BlockSpec((tm, c), lambda i: (i, 0)),
        compiler_params=_compiler_params(("parallel",)),
    )(x2d, res2d, w3, b3)


def conv3x3_bn_relu(x_nhwc, w_oihw, scale, bias, stride):
    """3x3 conv (pad=1, stride) + folded BN + ReLU, one pallas grid step per image.

    No im2col expansion: the padded bf16 input is phase-decomposed (total bytes
    == padded input; identity / no-copy for stride 1) and the 9 taps are
    accumulated in-kernel as row-shifted matmuls over row-group tiles.
    """
    n, h, w, c = x_nhwc.shape
    cout = w_oihw.shape[0]
    s = stride
    assert s in (1, 2), "phase decomposition implemented for stride 1 and 2 only"
    ho = (h - 1) // s + 1
    wo = (w - 1) // s + 1
    ext = 2 // s                                     # max tap offset within a phase
    hp = max(-(-(h + 2) // s), ho + ext + (1 if ext else 0))
    wp = max(-(-(w + 2) // s), wo + ext)
    assert ext * wp + ext + ho * wp <= hp * wp       # all tap windows in bounds

    xp = jnp.pad(x_nhwc, ((0, 0), (1, hp * s - h - 1), (1, wp * s - w - 1), (0, 0)))
    if s == 1:
        # stride 1: phase decomposition is the identity -> pad + reshape only
        xph = xp.reshape(n, 1, hp * wp, c)
    else:
        xph = xp.reshape(n, hp, s, wp, s, c).transpose(0, 2, 4, 1, 3, 5)
        xph = xph.reshape(n, s * s, hp * wp, c)
    xph = xph.astype(jnp.bfloat16)

    # weights: OIHW -> (9, Cin, Cout), BN scale folded in, bf16 for the MXU
    wmat = (jnp.transpose(w_oihw, (2, 3, 1, 0)) * scale).astype(jnp.bfloat16)
    wmat = wmat.reshape(9, c, cout)
    bias = bias.reshape(1, cout).astype(jnp.float32)

    # row-group tile: ~<=256 flat rows so the f32 accumulator stays vreg-resident
    t_ho = max(1, min(ho, 256 // wp))

    out = pl.pallas_call(
        functools.partial(_conv3x3_kernel, stride=s, wp=wp, wo=wo, ho=ho, t_ho=t_ho),
        out_shape=jax.ShapeDtypeStruct((n, ho, wo, cout), jnp.bfloat16),
        grid=(n,),
        in_specs=[
            pl.BlockSpec((1, s * s, hp * wp, c), lambda i: (i, 0, 0, 0)),
            pl.BlockSpec((9, c, cout), lambda i: (0, 0, 0)),
            pl.BlockSpec((1, cout), lambda i: (0, 0)),
        ],
        out_specs=pl.BlockSpec((1, ho, wo, cout), lambda i: (i, 0, 0, 0)),
        compiler_params=_compiler_params(("parallel",)),
    )(xph, wmat, bias)
    return out                                        # (n, ho, wo, cout) bf16, compact


# ---------------------------------------------------------------------------
# BN folding + full Bottleneck forward
# ---------------------------------------------------------------------------
def _fold_bn(bn, eps=1e-5):
    scale = bn["gamma"] / jnp.sqrt(bn["var"] + eps)
    bias = bn["beta"] - bn["mean"] * scale
    return scale, bias


def _fold_conv1x1(w_oihw, scale):
    cout, cin = w_oihw.shape[:2]
    wm = w_oihw.reshape(cout, cin).T * scale         # (Cin, Cout), scale folded in
    return wm.astype(jnp.bfloat16)


def bottleneck_forward(x_nchw, params, stride):
    """Forward pass of Bottleneck (inference-mode BN).  Input NCHW."""
    # TODO(synk): NCHW<->NHWC transposes kept at the module boundary (PyTorch
    # layout contract); chained blocks should stay NHWC to avoid this tax.
    x = jnp.transpose(x_nchw, (0, 2, 3, 1))
    n, h, w, cin = x.shape
    x_bf = x.astype(jnp.bfloat16)

    # conv1 (1x1) + bn1 + relu   (bf16 output: no f32 intermediate HBM traffic)
    s1, b1 = _fold_bn(params["bn1"])
    w1 = _fold_conv1x1(params["w1"], s1)
    planes = w1.shape[1]
    o1 = fused_matmul_bias(
        x_bf.reshape(n * h * w, cin), w1,
        b1.reshape(1, planes).astype(jnp.float32),
        relu=True, out_dtype=jnp.bfloat16)
    o1 = o1.reshape(n, h, w, planes)
    # TODO(synk): conv1 could be fused into the 3x3 kernel (compute the o1 row
    # window in-kernel) to drop the o1 HBM round trip entirely.

    # conv2 (3x3, stride, pad=1) + bn2 + relu  (in-kernel 9-tap row-tiled accum,
    # crop fused into the kernel stores -> compact (n, ho, wo, planes) bf16)
    s2, b2 = _fold_bn(params["bn2"])
    o2 = conv3x3_bn_relu(o1, params["w2"], s2, b2, stride)
    _, ho, wo, _ = o2.shape
    o2_2d = o2.reshape(n * ho * wo, planes)

    # conv3 (1x1) + bn3 + shortcut + relu, fused in a single kernel
    s3, b3 = _fold_bn(params["bn3"])
    w3 = _fold_conv1x1(params["w3"], s3)
    cexp = w3.shape[1]
    b3 = b3.reshape(1, cexp).astype(jnp.float32)

    if "w_sc" in params:                             # projection shortcut
        ssc, bsc = _fold_bn(params["bn_sc"])
        wsc = _fold_conv1x1(params["w_sc"], ssc)
        if stride == 1:
            xs = x_bf.reshape(n * h * w, cin)
        else:
            # strided subsample read straight from the NCHW input so XLA fuses
            # slice + layout transpose + bf16 cast into one pass.
            # TODO(synk): could be folded into the kernel's DMA via a strided
            # index_map to remove this small materialization entirely.
            xs = jnp.transpose(x_nchw[:, :, ::stride, ::stride],
                               (0, 2, 3, 1)).astype(jnp.bfloat16)
            xs = xs.reshape(n * ho * wo, cin)
        out = fused_conv3_shortcut(
            o2_2d, xs, w3, b3, wsc, bsc.reshape(1, cexp).astype(jnp.float32),
            out_dtype=jnp.float32)
    else:                                            # identity shortcut
        res = x_bf.reshape(n * h * w, cexp)
        out = fused_conv3_identity(o2_2d, res, w3, b3, out_dtype=jnp.float32)

    out = out.reshape(n, ho, wo, cexp)
    return jnp.transpose(out, (0, 3, 1, 2))          # back to NCHW


# ---------------------------------------------------------------------------
# Pure-JAX reference (same bf16 cast points -> tight tolerance)
# ---------------------------------------------------------------------------
def bottleneck_reference(x_nchw, params, stride):
    x = jnp.transpose(x_nchw, (0, 2, 3, 1))

    def conv(inp, w_oihw, scale, s, padding):
        wf = (jnp.transpose(w_oihw, (2, 3, 1, 0)) * scale).astype(jnp.bfloat16)
        return lax.conv_general_dilated(
            inp.astype(jnp.bfloat16), wf, (s, s), padding,
            dimension_numbers=("NHWC", "HWIO", "NHWC"),
            preferred_element_type=jnp.float32)

    s1, b1 = _fold_bn(params["bn1"])
    o = jax.nn.relu(conv(x, params["w1"], s1, 1, "VALID") + b1)
    s2, b2 = _fold_bn(params["bn2"])
    o = jax.nn.relu(conv(o, params["w2"], s2, stride, [(1, 1), (1, 1)]) + b2)
    o = o.astype(jnp.bfloat16)
    s3, b3 = _fold_bn(params["bn3"])
    o = conv(o, params["w3"], s3, 1, "VALID") + b3
    if "w_sc" in params:
        ssc, bsc = _fold_bn(params["bn_sc"])
        sc = conv(x, params["w_sc"], ssc, stride, "VALID") + bsc
    else:
        sc = x.astype(jnp.bfloat16).astype(jnp.float32)
    return jnp.transpose(jax.nn.relu(o + sc), (0, 3, 1, 2))


# ---------------------------------------------------------------------------
def make_params(key, in_planes, planes, stride, expansion=4):
    cexp = expansion * planes
    ks = jax.random.split(key, 8)

    def bn_params(k, c):
        k1, k2, k3, k4 = jax.random.split(k, 4)
        return {
            "gamma": jax.random.uniform(k1, (c,), jnp.float32, 0.5, 1.5),
            "beta": jax.random.normal(k2, (c,), jnp.float32) * 0.1,
            "mean": jax.random.normal(k3, (c,), jnp.float32) * 0.1,
            "var": jax.random.uniform(k4, (c,), jnp.float32, 0.5, 1.5),
        }

    params = {
        "w1": jax.random.normal(ks[0], (planes, in_planes, 1, 1), jnp.float32) * 0.2,
        "bn1": bn_params(ks[1], planes),
        "w2": jax.random.normal(ks[2], (planes, planes, 3, 3), jnp.float32) * 0.2,
        "bn2": bn_params(ks[3], planes),
        "w3": jax.random.normal(ks[4], (cexp, planes, 1, 1), jnp.float32) * 0.2,
        "bn3": bn_params(ks[5], cexp),
    }
    if stride != 1 or in_planes != cexp:             # projection shortcut needed
        params["w_sc"] = jax.random.normal(
            ks[6], (cexp, in_planes, 1, 1), jnp.float32) * 0.2
        params["bn_sc"] = bn_params(ks[7], cexp)
    return params


if __name__ == "__main__":
    key = jax.random.PRNGKey(0)
    k_x, k_p, k_x2, k_p2 = jax.random.split(key, 4)

    # config 1: downsampling block (projection shortcut active)
    in_planes, planes, stride = 8, 4, 2
    n, h, w = 2, 16, 16
    x = jax.random.normal(k_x, (n, in_planes, h, w), jnp.float32)
    params = make_params(k_p, in_planes, planes, stride)
    out = jax.block_until_ready(
        jax.jit(functools.partial(bottleneck_forward, stride=stride))(x, params))
    ref = bottleneck_reference(x, params, stride)
    assert out.shape == (n, 4 * planes, h // stride, w // stride), out.shape
    assert jnp.allclose(out, ref, rtol=2e-2, atol=2e-2), \
        float(jnp.max(jnp.abs(out - ref)))

    # config 2: identity shortcut (stride=1, in_planes == expansion*planes)
    in_planes2, planes2, stride2 = 16, 4, 1
    n2, h2, w2 = 2, 8, 8
    x2 = jax.random.normal(k_x2, (n2, in_planes2, h2, w2), jnp.float32)
    params2 = make_params(k_p2, in_planes2, planes2, stride2)
    out2 = jax.block_until_ready(
        jax.jit(functools.partial(bottleneck_forward, stride=stride2))(x2, params2))
    ref2 = bottleneck_reference(x2, params2, stride2)
    assert out2.shape == (n2, 4 * planes2, h2, w2), out2.shape
    assert jnp.allclose(out2, ref2, rtol=2e-2, atol=2e-2), \
        float(jnp.max(jnp.abs(out2 - ref2)))

    # TODO(synk): BatchNorm is folded in inference (running-stats) mode;
    # PyTorch training-mode batch statistics are not reproduced.
    print("KERNEL_OK")
</pallas_src>

<mosaic_0001>
module attributes {stable_mosaic.version = 11 : i64} {
  func.func @_mm_bias_kernel(%arg0: i32, %arg1: memref<512x8xbf16, #tpu.memory_space<vmem>>, %arg2: memref<8x4xbf16, #tpu.memory_space<vmem>>, %arg3: memref<1x4xf32, #tpu.memory_space<vmem>>, %arg4: memref<512x4xbf16, #tpu.memory_space<vmem>>) attributes {dimension_semantics = [#tpu.dimension_semantics<parallel>], iteration_bounds = array<i64: 1>, scalar_prefetch = 0 : i64, scratch_operands = 0 : i64, tpu.core_type = #tpu.core_type<tc>, window_params = [{transform_indices = @transform_0, window_bounds = array<i64: 512, 8>}, {pipeline_mode = #tpu.pipeline_mode<synchronous>, transform_indices = @transform_1, window_bounds = array<i64: 8, 4>}, {pipeline_mode = #tpu.pipeline_mode<synchronous>, transform_indices = @transform_2, window_bounds = array<i64: 1, 4>}, {transform_indices = @transform_3, window_bounds = array<i64: 512, 4>}]} {
    %c0 = arith.constant 0 : index
    %c0_0 = arith.constant 0 : index
    %0 = vector.load %arg1[%c0, %c0_0] : memref<512x8xbf16, #tpu.memory_space<vmem>>, vector<512x8xbf16>
    %c0_1 = arith.constant 0 : index
    %c0_2 = arith.constant 0 : index
    %1 = vector.load %arg2[%c0_1, %c0_2] : memref<8x4xbf16, #tpu.memory_space<vmem>>, vector<8x4xbf16>
    %cst = arith.constant dense<0.000000e+00> : vector<512x4xf32>
    %2 = tpu.matmul %0, %1, %cst {dimension_numbers = #tpu.dot_dimension_numbers<[1], [0], [0], [1], [0, 0, 1, 1], [], []>} : vector<512x8xbf16>, vector<8x4xbf16>, vector<512x4xf32> -> vector<512x4xf32>
    %c0_3 = arith.constant 0 : index
    %c0_4 = arith.constant 0 : index
    %3 = vector.load %arg3[%c0_3, %c0_4] : memref<1x4xf32, #tpu.memory_space<vmem>>, vector<1x4xf32>
    %4 = vector.broadcast %3 : vector<1x4xf32> to vector<512x4xf32>
    %5 = arith.addf %2, %4 : vector<512x4xf32>
    %cst_5 = arith.constant 0.000000e+00 : f32
    %6 = vector.broadcast %cst_5 : f32 to vector<512x4xf32>
    %7 = arith.maximumf %5, %6 : vector<512x4xf32>
    %8 = arith.truncf %7 : vector<512x4xf32> to vector<512x4xbf16>
    %c0_6 = arith.constant 0 : index
    %c0_7 = arith.constant 0 : index
    %9 = vector.load %arg4[%c0_6, %c0_7] : memref<512x4xbf16, #tpu.memory_space<vmem>>, vector<512x4xbf16>
    tpu.vector_store %arg4[%c0_6, %c0_7], %8 {strides = array<i32>} : memref<512x4xbf16, #tpu.memory_space<vmem>>, vector<512x4xbf16>,
    return
  }
  func.func @transform_0(%arg0: i32) -> (i32, i32) {
    %c0_i32 = arith.constant 0 : i32
    %c0_i32_0 = arith.constant 0 : i32
    return %arg0, %c0_i32 : i32, i32
  }
  func.func @transform_1(%arg0: i32) -> (i32, i32) {
    %c0_i32 = arith.constant 0 : i32
    %c0_i32_0 = arith.constant 0 : i32
    %c0_i32_1 = arith.constant 0 : i32
    return %c0_i32, %c0_i32_0 : i32, i32
  }
  func.func @transform_2(%arg0: i32) -> (i32, i32) {
    %c0_i32 = arith.constant 0 : i32
    %c0_i32_0 = arith.constant 0 : i32
    %c0_i32_1 = arith.constant 0 : i32
    return %c0_i32, %c0_i32_0 : i32, i32
  }
  func.func @transform_3(%arg0: i32) -> (i32, i32) {
    %c0_i32 = arith.constant 0 : i32
    %c0_i32_0 = arith.constant 0 : i32
    return %arg0, %c0_i32 : i32, i32
  }
}

module attributes {stable_mosaic.version = 11 : i64} {
  func.func @_conv3x3_kernel(%arg0: i32, %arg1: memref<1x4x90x4xbf16, #tpu.memory_space<vmem>>, %arg2: memref<9x4x4xbf16, #tpu.memory_space<vmem>>, %arg3: memref<1x4xf32, #tpu.memory_space<vmem>>, %arg4: memref<1x8x8x4xbf16, #tpu.memory_space<vmem>>) attributes {dimension_semantics = [#tpu.dimension_semantics<parallel>], iteration_bounds = array<i64: 2>, scalar_prefetch = 0 : i64, scratch_operands = 0 : i64, tpu.core_type = #tpu.core_type<tc>, window_params = [{transform_indices = @transform_0, window_bounds = array<i64: 1, 4, 90, 4>}, {pipeline_mode = #tpu.pipeline_mode<synchronous>, transform_indices = @transform_1, window_bounds = array<i64: 9, 4, 4>}, {pipeline_mode = #tpu.pipeline_mode<synchronous>, transform_indices = @transform_2, window_bounds = array<i64: 1, 4>}, {transform_indices = @transform_3, window_bounds = array<i64: 1, 8, 8, 4>}]} {
    %cst = arith.constant 0.000000e+00 : f32
    %0 = vector.broadcast %cst : f32 to vector<72x4xf32>
    %c0 = arith.constant 0 : index
    %c0_0 = arith.constant 0 : index
    %c0_1 = arith.constant 0 : index
    %c0_2 = arith.constant 0 : index
    %1 = vector.load %arg1[%c0, %c0_0, %c0_1, %c0_2] : memref<1x4x90x4xbf16, #tpu.memory_space<vmem>>, vector<1x1x72x4xbf16>
    %2 = vector.shape_cast %1 : vector<1x1x72x4xbf16> to vector<72x4xbf16>
    %c0_3 = arith.constant 0 : index
    %c0_4 = arith.constant 0 : index
    %c0_5 = arith.constant 0 : index
    %3 = vector.load %arg2[%c0_3, %c0_4, %c0_5] : memref<9x4x4xbf16, #tpu.memory_space<vmem>>, vector<1x4x4xbf16>
    %4 = vector.shape_cast %3 : vector<1x4x4xbf16> to vector<4x4xbf16>
    %cst_6 = arith.constant dense<0.000000e+00> : vector<72x4xf32>
    %5 = tpu.matmul %2, %4, %cst_6 {dimension_numbers = #tpu.dot_dimension_numbers<[1], [0], [0], [1], [0, 0, 1, 1], [], []>} : vector<72x4xbf16>, vector<4x4xbf16>, vector<72x4xf32> -> vector<72x4xf32>
    %6 = arith.addf %0, %5 : vector<72x4xf32>
    %c0_7 = arith.constant 0 : index
    %c1 = arith.constant 1 : index
    %c0_8 = arith.constant 0 : index
    %c0_9 = arith.constant 0 : index
    %7 = vector.load %arg1[%c0_7, %c1, %c0_8, %c0_9] : memref<1x4x90x4xbf16, #tpu.memory_space<vmem>>, vector<1x1x72x4xbf16>
    %8 = vector.shape_cast %7 : vector<1x1x72x4xbf16> to vector<72x4xbf16>
    %c1_10 = arith.constant 1 : index
    %c0_11 = arith.constant 0 : index
    %c0_12 = arith.constant 0 : index
    %9 = vector.load %arg2[%c1_10, %c0_11, %c0_12] : memref<9x4x4xbf16, #tpu.memory_space<vmem>>, vector<1x4x4xbf16>
    %10 = vector.shape_cast %9 : vector<1x4x4xbf16> to vector<4x4xbf16>
    %cst_13 = arith.constant dense<0.000000e+00> : vector<72x4xf32>
    %11 = tpu.matmul %8, %10, %cst_13 {dimension_numbers = #tpu.dot_dimension_numbers<[1], [0], [0], [1], [0, 0, 1, 1], [], []>} : vector<72x4xbf16>, vector<4x4xbf16>, vector<72x4xf32> -> vector<72x4xf32>
    %12 = arith.addf %6, %11 : vector<72x4xf32>
    %c0_14 = arith.constant 0 : index
    %c0_15 = arith.constant 0 : index
    %c1_16 = arith.constant 1 : index
    %c0_17 = arith.constant 0 : index
    %13 = vector.load %arg1[%c0_14, %c0_15, %c1_16, %c0_17] : memref<1x4x90x4xbf16, #tpu.memory_space<vmem>>, vector<1x1x72x4xbf16>
    %14 = vector.shape_cast %13 : vector<1x1x72x4xbf16> to vector<72x4xbf16>
    %c2 = arith.constant 2 : index
    %c0_18 = arith.constant 0 : index
    %c0_19 = arith.constant 0 : index
    %15 = vector.load %arg2[%c2, %c0_18, %c0_19] : memref<9x4x4xbf16, #tpu.memory_space<vmem>>, vector<1x4x4xbf16>
    %16 = vector.shape_cast %15 : vector<1x4x4xbf16> to vector<4x4xbf16>
    %cst_20 = arith.constant dense<0.000000e+00> : vector<72x4xf32>
    %17 = tpu.matmul %14, %16, %cst_20 {dimension_numbers = #tpu.dot_dimension_numbers<[1], [0], [0], [1], [0, 0, 1, 1], [], []>} : vector<72x4xbf16>, vector<4x4xbf16>, vector<72x4xf32> -> vector<72x4xf32>
    %18 = arith.addf %12, %17 : vector<72x4xf32>
    %c0_21 = arith.constant 0 : index
    %c2_22 = arith.constant 2 : index
    %c0_23 = arith.constant 0 : index
    %c0_24 = arith.constant 0 : index
    %19 = vector.load %arg1[%c0_21, %c2_22, %c0_23, %c0_24] : memref<1x4x90x4xbf16, #tpu.memory_space<vmem>>, vector<1x1x72x4xbf16>
    %20 = vector.shape_cast %19 : vector<1x1x72x4xbf16> to vector<72x4xbf16>
    %c3 = arith.constant 3 : index
    %c0_25 = arith.constant 0 : index
    %c0_26 = arith.constant 0 : index
    %21 = vector.load %arg2[%c3, %c0_25, %c0_26] : memref<9x4x4xbf16, #tpu.memory_space<vmem>>, vector<1x4x4xbf16>
    %22 = vector.shape_cast %21 : vector<1x4x4xbf16> to vector<4x4xbf16>
    %cst_27 = arith.constant dense<0.000000e+00> : vector<72x4xf32>
    %23 = tpu.matmul %20, %22, %cst_27 {dimension_numbers = #tpu.dot_dimension_numbers<[1], [0], [0], [1], [0, 0, 1, 1], [], []>} : vector<72x4xbf16>, vector<4x4xbf16>, vector<72x4xf32> -> vector<72x4xf32>
    %24 = arith.addf %18, %23 : vector<72x4xf32>
    %c0_28 = arith.constant 0 : index
    %c3_29 = arith.constant 3 : index
    %c0_30 = arith.constant 0 : index
    %c0_31 = arith.constant 0 : index
    %25 = vector.load %arg1[%c0_28, %c3_29, %c0_30, %c0_31] : memref<1x4x90x4xbf16, #tpu.memory_space<vmem>>, vector<1x1x72x4xbf16>
    %26 = vector.shape_cast %25 : vector<1x1x72x4xbf16> to vector<72x4xbf16>
    %c4 = arith.constant 4 : index
    %c0_32 = arith.constant 0 : index
    %c0_33 = arith.constant 0 : index
    %27 = vector.load %arg2[%c4, %c0_32, %c0_33] : memref<9x4x4xbf16, #tpu.memory_space<vmem>>, vector<1x4x4xbf16>
    %28 = vector.shape_cast %27 : vector<1x4x4xbf16> to vector<4x4xbf16>
    %cst_34 = arith.constant dense<0.000000e+00> : vector<72x4xf32>
    %29 = tpu.matmul %26, %28, %cst_34 {dimension_numbers = #tpu.dot_dimension_numbers<[1], [0], [0], [1], [0, 0, 1, 1], [], []>} : vector<72x4xbf16>, vector<4x4xbf16>, vector<72x4xf32> -> vector<72x4xf32>
    %30 = arith.addf %24, %29 : vector<72x4xf32>
    %c0_35 = arith.constant 0 : index
    %c2_36 = arith.constant 2 : index
    %c1_37 = arith.constant 1 : index
    %c0_38 = arith.constant 0 : index
    %31 = vector.load %arg1[%c0_35, %c2_36, %c1_37, %c0_38] : memref<1x4x90x4xbf16, #tpu.memory_space<vmem>>, vector<1x1x72x4xbf16>
    %32 = vector.shape_cast %31 : vector<1x1x72x4xbf16> to vector<72x4xbf16>
    %c5 = arith.constant 5 : index
    %c0_39 = arith.constant 0 : index
    %c0_40 = arith.constant 0 : index
    %33 = vector.load %arg2[%c5, %c0_39, %c0_40] : memref<9x4x4xbf16, #tpu.memory_space<vmem>>, vector<1x4x4xbf16>
    %34 = vector.shape_cast %33 : vector<1x4x4xbf16> to vector<4x4xbf16>
    %cst_41 = arith.constant dense<0.000000e+00> : vector<72x4xf32>
    %35 = tpu.matmul %32, %34, %cst_41 {dimension_numbers = #tpu.dot_dimension_numbers<[1], [0], [0], [1], [0, 0, 1, 1], [], []>} : vector<72x4xbf16>, vector<4x4xbf16>, vector<72x4xf32> -> vector<72x4xf32>
    %36 = arith.addf %30, %35 : vector<72x4xf32>
    %c0_42 = arith.constant 0 : index
    %c0_43 = arith.constant 0 : index
    %c9 = arith.constant 9 : index
    %c0_44 = arith.constant 0 : index
    %37 = vector.load %arg1[%c0_42, %c0_43, %c9, %c0_44] : memref<1x4x90x4xbf16, #tpu.memory_space<vmem>>, vector<1x1x72x4xbf16>
    %38 = vector.shape_cast %37 : vector<1x1x72x4xbf16> to vector<72x4xbf16>
    %c6 = arith.constant 6 : index
    %c0_45 = arith.constant 0 : index
    %c0_46 = arith.constant 0 : index
    %39 = vector.load %arg2[%c6, %c0_45, %c0_46] : memref<9x4x4xbf16, #tpu.memory_space<vmem>>, vector<1x4x4xbf16>
    %40 = vector.shape_cast %39 : vector<1x4x4xbf16> to vector<4x4xbf16>
    %cst_47 = arith.constant dense<0.000000e+00> : vector<72x4xf32>
    %41 = tpu.matmul %38, %40, %cst_47 {dimension_numbers = #tpu.dot_dimension_numbers<[1], [0], [0], [1], [0, 0, 1, 1], [], []>} : vector<72x4xbf16>, vector<4x4xbf16>, vector<72x4xf32> -> vector<72x4xf32>
    %42 = arith.addf %36, %41 : vector<72x4xf32>
    %c0_48 = arith.constant 0 : index
    %c1_49 = arith.constant 1 : index
    %c9_50 = arith.constant 9 : index
    %c0_51 = arith.constant 0 : index
    %43 = vector.load %arg1[%c0_48, %c1_49, %c9_50, %c0_51] : memref<1x4x90x4xbf16, #tpu.memory_space<vmem>>, vector<1x1x72x4xbf16>
    %44 = vector.shape_cast %43 : vector<1x1x72x4xbf16> to vector<72x4xbf16>
    %c7 = arith.constant 7 : index
    %c0_52 = arith.constant 0 : index
    %c0_53 = arith.constant 0 : index
    %45 = vector.load %arg2[%c7, %c0_52, %c0_53] : memref<9x4x4xbf16, #tpu.memory_space<vmem>>, vector<1x4x4xbf16>
    %46 = vector.shape_cast %45 : vector<1x4x4xbf16> to vector<4x4xbf16>
    %cst_54 = arith.constant dense<0.000000e+00> : vector<72x4xf32>
    %47 = tpu.matmul %44, %46, %cst_54 {dimension_numbers = #tpu.dot_dimension_numbers<[1], [0], [0], [1], [0, 0, 1, 1], [], []>} : vector<72x4xbf16>, vector<4x4xbf16>, vector<72x4xf32> -> vector<72x4xf32>
    %48 = arith.addf %42, %47 : vector<72x4xf32>
    %c0_55 = arith.constant 0 : index
    %c0_56 = arith.constant 0 : index
    %c10 = arith.constant 10 : index
    %c0_57 = arith.constant 0 : index
    %49 = vector.load %arg1[%c0_55, %c0_56, %c10, %c0_57] : memref<1x4x90x4xbf16, #tpu.memory_space<vmem>>, vector<1x1x72x4xbf16>
    %50 = vector.shape_cast %49 : vector<1x1x72x4xbf16> to vector<72x4xbf16>
    %c8 = arith.constant 8 : index
    %c0_58 = arith.constant 0 : index
    %c0_59 = arith.constant 0 : index
    %51 = vector.load %arg2[%c8, %c0_58, %c0_59] : memref<9x4x4xbf16, #tpu.memory_space<vmem>>, vector<1x4x4xbf16>
    %52 = vector.shape_cast %51 : vector<1x4x4xbf16> to vector<4x4xbf16>
    %cst_60 = arith.constant dense<0.000000e+00> : vector<72x4xf32>
    %53 = tpu.matmul %50, %52, %cst_60 {dimension_numbers = #tpu.dot_dimension_numbers<[1], [0], [0], [1], [0, 0, 1, 1], [], []>} : vector<72x4xbf16>, vector<4x4xbf16>, vector<72x4xf32> -> vector<72x4xf32>
    %54 = arith.addf %48, %53 : vector<72x4xf32>
    %c0_61 = arith.constant 0 : index
    %c0_62 = arith.constant 0 : index
    %55 = vector.load %arg3[%c0_61, %c0_62] : memref<1x4xf32, #tpu.memory_space<vmem>>, vector<1x4xf32>
    %56 = vector.broadcast %55 : vector<1x4xf32> to vector<72x4xf32>
    %57 = arith.addf %54, %56 : vector<72x4xf32>
    %cst_63 = arith.constant 0.000000e+00 : f32
    %58 = vector.broadcast %cst_63 : f32 to vector<72x4xf32>
    %59 = arith.maximumf %57, %58 : vector<72x4xf32>
    %60 = vector.extract_strided_slice %59 {offsets = [0, 0], sizes = [8, 4], strides = [1, 1]} : vector<72x4xf32> to vector<8x4xf32>
    %61 = arith.truncf %60 : vector<8x4xf32> to vector<8x4xbf16>
    %c0_64 = arith.constant 0 : index
    %c0_65 = arith.constant 0 : index
    %c0_66 = arith.constant 0 : index
    %c0_67 = arith.constant 0 : index
    %62 = vector.load %arg4[%c0_64, %c0_65, %c0_66, %c0_67] : memref<1x8x8x4xbf16, #tpu.memory_space<vmem>>, vector<1x1x8x4xbf16>
    %63 = vector.shape_cast %62 : vector<1x1x8x4xbf16> to vector<8x4xbf16>
    %64 = vector.shape_cast %61 : vector<8x4xbf16> to vector<1x1x8x4xbf16>
    tpu.vector_store %arg4[%c0_64, %c0_65, %c0_66, %c0_67], %64 {strides = array<i32>} : memref<1x8x8x4xbf16, #tpu.memory_space<vmem>>, vector<1x1x8x4xbf16>,
    %65 = vector.extract_strided_slice %59 {offsets = [9, 0], sizes = [8, 4], strides = [1, 1]} : vector<72x4xf32> to vector<8x4xf32>
    %66 = arith.truncf %65 : vector<8x4xf32> to vector<8x4xbf16>
    %c0_68 = arith.constant 0 : index
    %c1_69 = arith.constant 1 : index
    %c0_70 = arith.constant 0 : index
    %c0_71 = arith.constant 0 : index
    %67 = vector.load %arg4[%c0_68, %c1_69, %c0_70, %c0_71] : memref<1x8x8x4xbf16, #tpu.memory_space<vmem>>, vector<1x1x8x4xbf16>
    %68 = vector.shape_cast %67 : vector<1x1x8x4xbf16> to vector<8x4xbf16>
    %69 = vector.shape_cast %66 : vector<8x4xbf16> to vector<1x1x8x4xbf16>
    tpu.vector_store %arg4[%c0_68, %c1_69, %c0_70, %c0_71], %69 {strides = array<i32>} : memref<1x8x8x4xbf16, #tpu.memory_space<vmem>>, vector<1x1x8x4xbf16>,
    %70 = vector.extract_strided_slice %59 {offsets = [18, 0], sizes = [8, 4], strides = [1, 1]} : vector<72x4xf32> to vector<8x4xf32>
    %71 = arith.truncf %70 : vector<8x4xf32> to vector<8x4xbf16>
    %c0_72 = arith.constant 0 : index
    %c2_73 = arith.constant 2 : index
    %c0_74 = arith.constant 0 : index
    %c0_75 = arith.constant 0 : index
    %72 = vector.load %arg4[%c0_72, %c2_73, %c0_74, %c0_75] : memref<1x8x8x4xbf16, #tpu.memory_space<vmem>>, vector<1x1x8x4xbf16>
    %73 = vector.shape_cast %72 : vector<1x1x8x4xbf16> to vector<8x4xbf16>
    %74 = vector.shape_cast %71 : vector<8x4xbf16> to vector<1x1x8x4xbf16>
    tpu.vector_store %arg4[%c0_72, %c2_73, %c0_74, %c0_75], %74 {strides = array<i32>} : memref<1x8x8x4xbf16, #tpu.memory_space<vmem>>, vector<1x1x8x4xbf16>,
    %75 = vector.extract_strided_slice %59 {offsets = [27, 0], sizes = [8, 4], strides = [1, 1]} : vector<72x4xf32> to vector<8x4xf32>
    %76 = arith.truncf %75 : vector<8x4xf32> to vector<8x4xbf16>
    %c0_76 = arith.constant 0 : index
    %c3_77 = arith.constant 3 : index
    %c0_78 = arith.constant 0 : index
    %c0_79 = arith.constant 0 : index
    %77 = vector.load %arg4[%c0_76, %c3_77, %c0_78, %c0_79] : memref<1x8x8x4xbf16, #tpu.memory_space<vmem>>, vector<1x1x8x4xbf16>
    %78 = vector.shape_cast %77 : vector<1x1x8x4xbf16> to vector<8x4xbf16>
    %79 = vector.shape_cast %76 : vector<8x4xbf16> to vector<1x1x8x4xbf16>
    tpu.vector_store %arg4[%c0_76, %c3_77, %c0_78, %c0_79], %79 {strides = array<i32>} : memref<1x8x8x4xbf16, #tpu.memory_space<vmem>>, vector<1x1x8x4xbf16>,
    %80 = vector.extract_strided_slice %59 {offsets = [36, 0], sizes = [8, 4], strides = [1, 1]} : vector<72x4xf32> to vector<8x4xf32>
    %81 = arith.truncf %80 : vector<8x4xf32> to vector<8x4xbf16>
    %c0_80 = arith.constant 0 : index
    %c4_81 = arith.constant 4 : index
    %c0_82 = arith.constant 0 : index
    %c0_83 = arith.constant 0 : index
    %82 = vector.load %arg4[%c0_80, %c4_81, %c0_82, %c0_83] : memref<1x8x8x4xbf16, #tpu.memory_space<vmem>>, vector<1x1x8x4xbf16>
    %83 = vector.shape_cast %82 : vector<1x1x8x4xbf16> to vector<8x4xbf16>
    %84 = vector.shape_cast %81 : vector<8x4xbf16> to vector<1x1x8x4xbf16>
    tpu.vector_store %arg4[%c0_80, %c4_81, %c0_82, %c0_83], %84 {strides = array<i32>} : memref<1x8x8x4xbf16, #tpu.memory_space<vmem>>, vector<1x1x8x4xbf16>,
    %85 = vector.extract_strided_slice %59 {offsets = [45, 0], sizes = [8, 4], strides = [1, 1]} : vector<72x4xf32> to vector<8x4xf32>
    %86 = arith.truncf %85 : vector<8x4xf32> to vector<8x4xbf16>
    %c0_84 = arith.constant 0 : index
    %c5_85 = arith.constant 5 : index
    %c0_86 = arith.constant 0 : index
    %c0_87 = arith.constant 0 : index
    %87 = vector.load %arg4[%c0_84, %c5_85, %c0_86, %c0_87] : memref<1x8x8x4xbf16, #tpu.memory_space<vmem>>, vector<1x1x8x4xbf16>
    %88 = vector.shape_cast %87 : vector<1x1x8x4xbf16> to vector<8x4xbf16>
    %89 = vector.shape_cast %86 : vector<8x4xbf16> to vector<1x1x8x4xbf16>
    tpu.vector_store %arg4[%c0_84, %c5_85, %c0_86, %c0_87], %89 {strides = array<i32>} : memref<1x8x8x4xbf16, #tpu.memory_space<vmem>>, vector<1x1x8x4xbf16>,
    %90 = vector.extract_strided_slice %59 {offsets = [54, 0], sizes = [8, 4], strides = [1, 1]} : vector<72x4xf32> to vector<8x4xf32>
    %91 = arith.truncf %90 : vector<8x4xf32> to vector<8x4xbf16>
    %c0_88 = arith.constant 0 : index
    %c6_89 = arith.constant 6 : index
    %c0_90 = arith.constant 0 : index
    %c0_91 = arith.constant 0 : index
    %92 = vector.load %arg4[%c0_88, %c6_89, %c0_90, %c0_91] : memref<1x8x8x4xbf16, #tpu.memory_space<vmem>>, vector<1x1x8x4xbf16>
    %93 = vector.shape_cast %92 : vector<1x1x8x4xbf16> to vector<8x4xbf16>
    %94 = vector.shape_cast %91 : vector<8x4xbf16> to vector<1x1x8x4xbf16>
    tpu.vector_store %arg4[%c0_88, %c6_89, %c0_90, %c0_91], %94 {strides = array<i32>} : memref<1x8x8x4xbf16, #tpu.memory_space<vmem>>, vector<1x1x8x4xbf16>,
    %95 = vector.extract_strided_slice %59 {offsets = [63, 0], sizes = [8, 4], strides = [1, 1]} : vector<72x4xf32> to vector<8x4xf32>
    %96 = arith.truncf %95 : vector<8x4xf32> to vector<8x4xbf16>
    %c0_92 = arith.constant 0 : index
    %c7_93 = arith.constant 7 : index
    %c0_94 = arith.constant 0 : index
    %c0_95 = arith.constant 0 : index
    %97 = vector.load %arg4[%c0_92, %c7_93, %c0_94, %c0_95] : memref<1x8x8x4xbf16, #tpu.memory_space<vmem>>, vector<1x1x8x4xbf16>
    %98 = vector.shape_cast %97 : vector<1x1x8x4xbf16> to vector<8x4xbf16>
    %99 = vector.shape_cast %96 : vector<8x4xbf16> to vector<1x1x8x4xbf16>
    tpu.vector_store %arg4[%c0_92, %c7_93, %c0_94, %c0_95], %99 {strides = array<i32>} : memref<1x8x8x4xbf16, #tpu.memory_space<vmem>>, vector<1x1x8x4xbf16>,
    return
  }
  func.func @transform_0(%arg0: i32) -> (i32, i32, i32, i32) {
    %c0_i32 = arith.constant 0 : i32
    %c0_i32_0 = arith.constant 0 : i32
    %c0_i32_1 = arith.constant 0 : i32
    %c0_i32_2 = arith.constant 0 : i32
    return %arg0, %c0_i32, %c0_i32_0, %c0_i32_1 : i32, i32, i32, i32
  }
  func.func @transform_1(%arg0: i32) -> (i32, i32, i32) {
    %c0_i32 = arith.constant 0 : i32
    %c0_i32_0 = arith.constant 0 : i32
    %c0_i32_1 = arith.constant 0 : i32
    %c0_i32_2 = arith.constant 0 : i32
    return %c0_i32, %c0_i32_0, %c0_i32_1 : i32, i32, i32
  }
  func.func @transform_2(%arg0: i32) -> (i32, i32) {
    %c0_i32 = arith.constant 0 : i32
    %c0_i32_0 = arith.constant 0 : i32
    %c0_i32_1 = arith.constant 0 : i32
    return %c0_i32, %c0_i32_0 : i32, i32
  }
  func.func @transform_3(%arg0: i32) -> (i32, i32, i32, i32) {
    %c0_i32 = arith.constant 0 : i32
    %c0_i32_0 = arith.constant 0 : i32
    %c0_i32_1 = arith.constant 0 : i32
    %c0_i32_2 = arith.constant 0 : i32
    return %arg0, %c0_i32, %c0_i32_0, %c0_i32_1 : i32, i32, i32, i32
  }
}

module attributes {stable_mosaic.version = 11 : i64} {
  func.func @_mm_bias_proj_relu_kernel(%arg0: i32, %arg1: memref<128x4xbf16, #tpu.memory_space<vmem>>, %arg2: memref<128x8xbf16, #tpu.memory_space<vmem>>, %arg3: memref<4x16xbf16, #tpu.memory_space<vmem>>, %arg4: memref<1x16xf32, #tpu.memory_space<vmem>>, %arg5: memref<8x16xbf16, #tpu.memory_space<vmem>>, %arg6: memref<1x16xf32, #tpu.memory_space<vmem>>, %arg7: memref<128x16xf32, #tpu.memory_space<vmem>>) attributes {dimension_semantics = [#tpu.dimension_semantics<parallel>], iteration_bounds = array<i64: 1>, scalar_prefetch = 0 : i64, scratch_operands = 0 : i64, tpu.core_type = #tpu.core_type<tc>, window_params = [{transform_indices = @transform_0, window_bounds = array<i64: 128, 4>}, {transform_indices = @transform_1, window_bounds = array<i64: 128, 8>}, {pipeline_mode = #tpu.pipeline_mode<synchronous>, transform_indices = @transform_2, window_bounds = array<i64: 4, 16>}, {pipeline_mode = #tpu.pipeline_mode<synchronous>, transform_indices = @transform_3, window_bounds = array<i64: 1, 16>}, {pipeline_mode = #tpu.pipeline_mode<synchronous>, transform_indices = @transform_4, window_bounds = array<i64: 8, 16>}, {pipeline_mode = #tpu.pipeline_mode<synchronous>, transform_indices = @transform_5, window_bounds = array<i64: 1, 16>}, {transform_indices = @transform_6, window_bounds = array<i64: 128, 16>}]} {
    %c0 = arith.constant 0 : index
    %c0_0 = arith.constant 0 : index
    %0 = vector.load %arg1[%c0, %c0_0] : memref<128x4xbf16, #tpu.memory_space<vmem>>, vector<128x4xbf16>
    %c0_1 = arith.constant 0 : index
    %c0_2 = arith.constant 0 : index
    %1 = vector.load %arg3[%c0_1, %c0_2] : memref<4x16xbf16, #tpu.memory_space<vmem>>, vector<4x16xbf16>
    %cst = arith.constant dense<0.000000e+00> : vector<128x16xf32>
    %2 = tpu.matmul %0, %1, %cst {dimension_numbers = #tpu.dot_dimension_numbers<[1], [0], [0], [1], [0, 0, 1, 1], [], []>} : vector<128x4xbf16>, vector<4x16xbf16>, vector<128x16xf32> -> vector<128x16xf32>
    %c0_3 = arith.constant 0 : index
    %c0_4 = arith.constant 0 : index
    %3 = vector.load %arg4[%c0_3, %c0_4] : memref<1x16xf32, #tpu.memory_space<vmem>>, vector<1x16xf32>
    %4 = vector.broadcast %3 : vector<1x16xf32> to vector<128x16xf32>
    %5 = arith.addf %2, %4 : vector<128x16xf32>
    %c0_5 = arith.constant 0 : index
    %c0_6 = arith.constant 0 : index
    %6 = vector.load %arg2[%c0_5, %c0_6] : memref<128x8xbf16, #tpu.memory_space<vmem>>, vector<128x8xbf16>
    %c0_7 = arith.constant 0 : index
    %c0_8 = arith.constant 0 : index
    %7 = vector.load %arg5[%c0_7, %c0_8] : memref<8x16xbf16, #tpu.memory_space<vmem>>, vector<8x16xbf16>
    %cst_9 = arith.constant dense<0.000000e+00> : vector<128x16xf32>
    %8 = tpu.matmul %6, %7, %cst_9 {dimension_numbers = #tpu.dot_dimension_numbers<[1], [0], [0], [1], [0, 0, 1, 1], [], []>} : vector<128x8xbf16>, vector<8x16xbf16>, vector<128x16xf32> -> vector<128x16xf32>
    %c0_10 = arith.constant 0 : index
    %c0_11 = arith.constant 0 : index
    %9 = vector.load %arg6[%c0_10, %c0_11] : memref<1x16xf32, #tpu.memory_space<vmem>>, vector<1x16xf32>
    %10 = vector.broadcast %9 : vector<1x16xf32> to vector<128x16xf32>
    %11 = arith.addf %8, %10 : vector<128x16xf32>
    %12 = arith.addf %5, %11 : vector<128x16xf32>
    %cst_12 = arith.constant 0.000000e+00 : f32
    %13 = vector.broadcast %cst_12 : f32 to vector<128x16xf32>
    %14 = arith.maximumf %12, %13 : vector<128x16xf32>
    %c0_13 = arith.constant 0 : index
    %c0_14 = arith.constant 0 : index
    %15 = vector.load %arg7[%c0_13, %c0_14] : memref<128x16xf32, #tpu.memory_space<vmem>>, vector<128x16xf32>
    tpu.vector_store %arg7[%c0_13, %c0_14], %14 {strides = array<i32>} : memref<128x16xf32, #tpu.memory_space<vmem>>, vector<128x16xf32>,
    return
  }
  func.func @transform_0(%arg0: i32) -> (i32, i32) {
    %c0_i32 = arith.constant 0 : i32
    %c0_i32_0 = arith.constant 0 : i32
    return %arg0, %c0_i32 : i32, i32
  }
  func.func @transform_1(%arg0: i32) -> (i32, i32) {
    %c0_i32 = arith.constant 0 : i32
    %c0_i32_0 = arith.constant 0 : i32
    return %arg0, %c0_i32 : i32, i32
  }
  func.func @transform_2(%arg0: i32) -> (i32, i32) {
    %c0_i32 = arith.constant 0 : i32
    %c0_i32_0 = arith.constant 0 : i32
    %c0_i32_1 = arith.constant 0 : i32
    return %c0_i32, %c0_i32_0 : i32, i32
  }
  func.func @transform_3(%arg0: i32) -> (i32, i32) {
    %c0_i32 = arith.constant 0 : i32
    %c0_i32_0 = arith.constant 0 : i32
    %c0_i32_1 = arith.constant 0 : i32
    return %c0_i32, %c0_i32_0 : i32, i32
  }
  func.func @transform_4(%arg0: i32) -> (i32, i32) {
    %c0_i32 = arith.constant 0 : i32
    %c0_i32_0 = arith.constant 0 : i32
    %c0_i32_1 = arith.constant 0 : i32
    return %c0_i32, %c0_i32_0 : i32, i32
  }
  func.func @transform_5(%arg0: i32) -> (i32, i32) {
    %c0_i32 = arith.constant 0 : i32
    %c0_i32_0 = arith.constant 0 : i32
    %c0_i32_1 = arith.constant 0 : i32
    return %c0_i32, %c0_i32_0 : i32, i32
  }
  func.func @transform_6(%arg0: i32) -> (i32, i32) {
    %c0_i32 = arith.constant 0 : i32
    %c0_i32_0 = arith.constant 0 : i32
    return %arg0, %c0_i32 : i32, i32
  }
}

</mosaic_0001>

<bundles_post_ra>
// kernel: bottleneck_forward.3
= control target key start
LH: loop header
LB: loop body
LE: loop exit
PB: predicated region body
PF: predicated region fallthrough
CT: control target
= control target key end

     0   :  { %vm341_vm0 = vcmask 1043456   ;;  %vm244_vm1 = vcmask 64512   ;;  %vm642_vm2 = vcmask 27648   ;;  %s1383_s1 = inlined_call_operand.vmem [shape: bf16[8,4], index: 1, kind: input, shape index: {}]   ;;  %s1384_s0 = inlined_call_operand.vmem [shape: bf16[512,8], index: 0, kind: input, shape index: {}]   ;;  %s1385_s2 = inlined_call_operand.vmem [shape: f32[1,4], index: 2, kind: input, shape index: {}]   ;;  %s1386_s3 = inlined_call_operand.vmem [shape: bf16[512,4], index: 3, kind: output, shape index: {}]  }
   0x1   :  { %v79_v0 = vld [vmem:[%s1383_s1] sm:$0xf]  ;;  %v872_v6 = vld [vmem:[%s1384_s0 + $0x8] sm:$0xff]  ;;  %v873_v10 = vld [vmem:[%s1384_s0 + $0x10] sm:$0xff] }
   0x2   :  { %v343_v1 = vsel %vm341_vm0, %v79_v0, 0  ;;  %v871_v2 = vld [vmem:[%s1384_s0] sm:$0xff]  ;;  %v880_v7 = vld [vmem:[%s1384_s0 + $0x48] sm:$0xff]  ;;  %v881_v11 = vld [vmem:[%s1384_s0 + $0x50] sm:$0xff] }
   0x3   :  { %v879_v3 = vld [vmem:[%s1384_s0 + $0x40] sm:$0xff]  ;;  %352 = vmatpush.bf16.msra.mxu0 %v343_v1  ;;  %903 = vmatpush.bf16.msra.mxu1 %v343_v1  ;;  %v888_v8 = vld [vmem:[%s1384_s0 + $0x88] sm:$0xff]  ;;  %v889_v12 = vld [vmem:[%s1384_s0 + $0x90] sm:$0xff] }
   0x4   :  { %v887_v4 = vld [vmem:[%s1384_s0 + $0x80] sm:$0xff]  ;;  %904 = vmatpush.bf16.msra.mxu2 %v343_v1  ;;  %905 = vmatpush.bf16.msra.mxu3 %v343_v1  ;;  %v896_v9 = vld [vmem:[%s1384_s0 + $0xc8] sm:$0xff]  ;;  %v897_v13 = vld [vmem:[%s1384_s0 + $0xd0] sm:$0xff] }
   0x5   :  { %v895_v5 = vld [vmem:[%s1384_s0 + $0xc0] sm:$0xff]  ;;  %v874_v14 = vld [vmem:[%s1384_s0 + $0x18] sm:$0xff]  ;;  %v876_v22 = vld [vmem:[%s1384_s0 + $0x28] sm:$0xff] }
   0x6   :  { %839 = vmatmul.msk.bf16.vlgmr.msra.gmra.mxu0 %vm244_vm1, %v871_v2  ;;  %847 = vmatmul.msk.bf16.vlgmr.msra.gmra.mxu1 %vm244_vm1, %v879_v3  ;;  %v882_v15 = vld [vmem:[%s1384_s0 + $0x58] sm:$0xff]  ;;  %v875_v18 = vld [vmem:[%s1384_s0 + $0x20] sm:$0xff]  ;;  %v884_v23 = vld [vmem:[%s1384_s0 + $0x68] sm:$0xff] }
   0x7   :  { %855 = vmatmul.msk.bf16.vlgmr.msra.gmra.mxu2 %vm244_vm1, %v887_v4  ;;  %863 = vmatmul.msk.bf16.vlgmr.msra.gmra.mxu3 %vm244_vm1, %v895_v5  ;;  %v890_v16 = vld [vmem:[%s1384_s0 + $0x98] sm:$0xff]  ;;  %v883_v19 = vld [vmem:[%s1384_s0 + $0x60] sm:$0xff]  ;;  %v892_v24 = vld [vmem:[%s1384_s0 + $0xa8] sm:$0xff] }
   0x8   :  { %v898_v17 = vld [vmem:[%s1384_s0 + $0xd8] sm:$0xff]  ;;  %v891_v20 = vld [vmem:[%s1384_s0 + $0xa0] sm:$0xff]  ;;  %v900_v25 = vld [vmem:[%s1384_s0 + $0xe8] sm:$0xff] }
   0x9   :  { %v899_v21 = vld [vmem:[%s1384_s0 + $0xe0] sm:$0xff]  ;;  %v877_v26 = vld [vmem:[%s1384_s0 + $0x30] sm:$0xff]  ;;  %v878_v30 = vld [vmem:[%s1384_s0 + $0x38] sm:$0xff] }
   0xa   :  { %v885_v27 = vld [vmem:[%s1384_s0 + $0x70] sm:$0xff]  ;;  %v886_v31 = vld [vmem:[%s1384_s0 + $0x78] sm:$0xff]  ;;  %v1061_v34 = vld [vmem:[%s1385_s2] ss:$0 sm:$0xff] }
   0xb   :  { %v893_v28 = vld [vmem:[%s1384_s0 + $0xb0] sm:$0xff]  ;;  %v894_v32 = vld [vmem:[%s1384_s0 + $0xb8] sm:$0xff] }
   0xc   :  { %v901_v29 = vld [vmem:[%s1384_s0 + $0xf0] sm:$0xff]  ;;  %v902_v33 = vld [vmem:[%s1384_s0 + $0xf8] sm:$0xff] }
  0x16   :  { %840 = vmatmul.msk.bf16.gmra.mxu0 %vm244_vm1, %v872_v6  ;;  %848 = vmatmul.msk.bf16.gmra.mxu1 %vm244_vm1, %v880_v7 }
  0x17   :  { %856 = vmatmul.msk.bf16.gmra.mxu2 %vm244_vm1, %v888_v8  ;;  %864 = vmatmul.msk.bf16.gmra.mxu3 %vm244_vm1, %v896_v9 }
  0x26   :  { %841 = vmatmul.msk.bf16.gmra.mxu0 %vm244_vm1, %v873_v10  ;;  %849 = vmatmul.msk.bf16.gmra.mxu1 %vm244_vm1, %v881_v11 }
  0x27   :  { %857 = vmatmul.msk.bf16.gmra.mxu2 %vm244_vm1, %v889_v12  ;;  %865 = vmatmul.msk.bf16.gmra.mxu3 %vm244_vm1, %v897_v13 }
  0x36   :  { %842 = vmatmul.msk.bf16.gmra.mxu0 %vm244_vm1, %v874_v14  ;;  %850 = vmatmul.msk.bf16.gmra.mxu1 %vm244_vm1, %v882_v15 }
  0x37   :  { %858 = vmatmul.msk.bf16.gmra.mxu2 %vm244_vm1, %v890_v16  ;;  %866 = vmatmul.msk.bf16.gmra.mxu3 %vm244_vm1, %v898_v17 }
  0x46   :  { %843 = vmatmul.msk.bf16.gmra.mxu0 %vm244_vm1, %v875_v18  ;;  %851 = vmatmul.msk.bf16.gmra.mxu1 %vm244_vm1, %v883_v19 }
  0x47   :  { %859 = vmatmul.msk.bf16.gmra.mxu2 %vm244_vm1, %v891_v20  ;;  %867 = vmatmul.msk.bf16.gmra.mxu3 %vm244_vm1, %v899_v21 }
  0x56   :  { %844 = vmatmul.msk.bf16.gmra.mxu0 %vm244_vm1, %v876_v22  ;;  %852 = vmatmul.msk.bf16.gmra.mxu1 %vm244_vm1, %v884_v23 }
  0x57   :  { %860 = vmatmul.msk.bf16.gmra.mxu2 %vm244_vm1, %v892_v24  ;;  %868 = vmatmul.msk.bf16.gmra.mxu3 %vm244_vm1, %v900_v25 }
  0x66   :  { %845 = vmatmul.msk.bf16.gmra.mxu0 %vm244_vm1, %v877_v26  ;;  %853 = vmatmul.msk.bf16.gmra.mxu1 %vm244_vm1, %v885_v27 }
  0x67   :  { %861 = vmatmul.msk.bf16.gmra.mxu2 %vm244_vm1, %v893_v28  ;;  %869 = vmatmul.msk.bf16.gmra.mxu3 %vm244_vm1, %v901_v29 }
  0x76   :  { %846 = vmatmul.msk.bf16.gmra.mxu0 %vm244_vm1, %v878_v30  ;;  %854 = vmatmul.msk.bf16.gmra.mxu1 %vm244_vm1, %v886_v31 }
  0x77   :  { %862 = vmatmul.msk.bf16.gmra.mxu2 %vm244_vm1, %v894_v32  ;;  %870 = vmatmul.msk.bf16.gmra.mxu3 %vm244_vm1, %v902_v33 }
  0x83   :  { %v354_v35 = vpop.f32.mrf.mxu0  ;;  %v394_v36 = vpop.f32.mrf.mxu1 }
  0x84   :  { %v355_v37 = vadd.f32 %v1061_v34, %v354_v35  ;;  %v395_v38 = vadd.f32 %v1061_v34, %v394_v36 }
  0x86   :  { %v514_v39 = vmax.f32 %v355_v37, 0.0  ;;  %v530_v40 = vmax.f32 %v395_v38, 0.0 }
  0x88   :  { %v578_v41 = vpack.c.bf16 %v514_v39, %v514_v39  ;;  %v594_v42 = vpack.c.bf16 %v530_v40, %v530_v40 }
  0x8a   :  { %643 = vst.msk [vmem:[%s1386_s3] sm:$0xf] %vm642_vm2, %v578_v41  ;;  %v434_v43 = vpop.f32.mrf.mxu2  ;;  %v474_v44 = vpop.f32.mrf.mxu3 }
  0x8b   :  { %659 = vst.msk [vmem:[%s1386_s3 + $0x40] sm:$0xf] %vm642_vm2, %v594_v42  ;;  %v435_v45 = vadd.f32 %v1061_v34, %v434_v43  ;;  %v475_v46 = vadd.f32 %v1061_v34, %v474_v44  ;;  %v356_v47 = vpop.f32.mrf.mxu0  ;;  %v396_v48 = vpop.f32.mrf.mxu1 }
  0x8c   :  { %v357_v49 = vadd.f32 %v1061_v34, %v356_v47  ;;  %v397_v50 = vadd.f32 %v1061_v34, %v396_v48 }
  0x8d   :  { %v546_v51 = vmax.f32 %v435_v45, 0.0  ;;  %v562_v52 = vmax.f32 %v475_v46, 0.0 }
  0x8e   :  { %v515_v53 = vmax.f32 %v357_v49, 0.0  ;;  %v531_v54 = vmax.f32 %v397_v50, 0.0 }
  0x8f   :  { %v610_v55 = vpack.c.bf16 %v546_v51, %v546_v51  ;;  %v626_v56 = vpack.c.bf16 %v562_v52, %v562_v52 }
  0x90   :  { %v579_v57 = vpack.c.bf16 %v515_v53, %v515_v53  ;;  %v595_v58 = vpack.c.bf16 %v531_v54, %v531_v54 }
  0x91   :  { %675 = vst.msk [vmem:[%s1386_s3 + $0x80] sm:$0xf] %vm642_vm2, %v610_v55 }
  0x92   :  { %691 = vst.msk [vmem:[%s1386_s3 + $0xc0] sm:$0xf] %vm642_vm2, %v626_v56  ;;  %v436_v59 = vpop.f32.mrf.mxu2  ;;  %v476_v60 = vpop.f32.mrf.mxu3 }
  0x93   :  { %644 = vst.msk [vmem:[%s1386_s3 + $0x4] sm:$0xf] %vm642_vm2, %v579_v57  ;;  %v437_v61 = vadd.f32 %v1061_v34, %v436_v59  ;;  %v477_v62 = vadd.f32 %v1061_v34, %v476_v60  ;;  %v359_v63 = vpop.f32.mrf.mxu0  ;;  %v399_v0 = vpop.f32.mrf.mxu1 }
  0x94   :  { %660 = vst.msk [vmem:[%s1386_s3 + $0x44] sm:$0xf] %vm642_vm2, %v595_v58  ;;  %v360_v1 = vadd.f32 %v1061_v34, %v359_v63  ;;  %v400_v2 = vadd.f32 %v1061_v34, %v399_v0 }
  0x95   :  { %v547_v3 = vmax.f32 %v437_v61, 0.0  ;;  %v563_v4 = vmax.f32 %v477_v62, 0.0 }
  0x96   :  { %v516_v5 = vmax.f32 %v360_v1, 0.0  ;;  %v532_v6 = vmax.f32 %v400_v2, 0.0 }
  0x97   :  { %v611_v7 = vpack.c.bf16 %v547_v3, %v547_v3  ;;  %v627_v8 = vpack.c.bf16 %v563_v4, %v563_v4 }
  0x98   :  { %v580_v9 = vpack.c.bf16 %v516_v5, %v516_v5  ;;  %v596_v10 = vpack.c.bf16 %v532_v6, %v532_v6 }
  0x99   :  { %676 = vst.msk [vmem:[%s1386_s3 + $0x84] sm:$0xf] %vm642_vm2, %v611_v7 }
  0x9a   :  { %692 = vst.msk [vmem:[%s1386_s3 + $0xc4] sm:$0xf] %vm642_vm2, %v627_v8  ;;  %v439_v11 = vpop.f32.mrf.mxu2  ;;  %v479_v12 = vpop.f32.mrf.mxu3 }
  0x9b   :  { %645 = vst.msk [vmem:[%s1386_s3 + $0x8] sm:$0xf] %vm642_vm2, %v580_v9  ;;  %v440_v13 = vadd.f32 %v1061_v34, %v439_v11  ;;  %v480_v14 = vadd.f32 %v1061_v34, %v479_v12  ;;  %v361_v15 = vpop.f32.mrf.mxu0  ;;  %v401_v16 = vpop.f32.mrf.mxu1 }
  0x9c   :  { %661 = vst.msk [vmem:[%s1386_s3 + $0x48] sm:$0xf] %vm642_vm2, %v596_v10  ;;  %v362_v17 = vadd.f32 %v1061_v34, %v361_v15  ;;  %v402_v18 = vadd.f32 %v1061_v34, %v401_v16 }
  0x9d   :  { %v548_v19 = vmax.f32 %v440_v13, 0.0  ;;  %v564_v20 = vmax.f32 %v480_v14, 0.0 }
  0x9e   :  { %v517_v21 = vmax.f32 %v362_v17, 0.0  ;;  %v533_v22 = vmax.f32 %v402_v18, 0.0 }
  0x9f   :  { %v612_v23 = vpack.c.bf16 %v548_v19, %v548_v19  ;;  %v628_v24 = vpack.c.bf16 %v564_v20, %v564_v20 }
  0xa0   :  { %v581_v25 = vpack.c.bf16 %v517_v21, %v517_v21  ;;  %v597_v26 = vpack.c.bf16 %v533_v22, %v533_v22 }
  0xa1   :  { %677 = vst.msk [vmem:[%s1386_s3 + $0x88] sm:$0xf] %vm642_vm2, %v612_v23 }
  0xa2   :  { %693 = vst.msk [vmem:[%s1386_s3 + $0xc8] sm:$0xf] %vm642_vm2, %v628_v24  ;;  %v441_v27 = vpop.f32.mrf.mxu2  ;;  %v481_v28 = vpop.f32.mrf.mxu3 }
  0xa3   :  { %646 = vst.msk [vmem:[%s1386_s3 + $0xc] sm:$0xf] %vm642_vm2, %v581_v25  ;;  %v442_v29 = vadd.f32 %v1061_v34, %v441_v27  ;;  %v482_v30 = vadd.f32 %v1061_v34, %v481_v28  ;;  %v364_v31 = vpop.f32.mrf.mxu0  ;;  %v404_v32 = vpop.f32.mrf.mxu1 }
  0xa4   :  { %662 = vst.msk [vmem:[%s1386_s3 + $0x4c] sm:$0xf] %vm642_vm2, %v597_v26  ;;  %v365_v33 = vadd.f32 %v1061_v34, %v364_v31  ;;  %v405_v35 = vadd.f32 %v1061_v34, %v404_v32 }
  0xa5   :  { %v549_v36 = vmax.f32 %v442_v29, 0.0  ;;  %v565_v37 = vmax.f32 %v482_v30, 0.0 }
  0xa6   :  { %v518_v38 = vmax.f32 %v365_v33, 0.0  ;;  %v534_v39 = vmax.f32 %v405_v35, 0.0 }
  0xa7   :  { %v613_v40 = vpack.c.bf16 %v549_v36, %v549_v36  ;;  %v629_v41 = vpack.c.bf16 %v565_v37, %v565_v37 }
  0xa8   :  { %v582_v42 = vpack.c.bf16 %v518_v38, %v518_v38  ;;  %v598_v43 = vpack.c.bf16 %v534_v39, %v534_v39 }
  0xa9   :  { %678 = vst.msk [vmem:[%s1386_s3 + $0x8c] sm:$0xf] %vm642_vm2, %v613_v40 }
  0xaa   :  { %694 = vst.msk [vmem:[%s1386_s3 + $0xcc] sm:$0xf] %vm642_vm2, %v629_v41  ;;  %v444_v44 = vpop.f32.mrf.mxu2  ;;  %v484_v45 = vpop.f32.mrf.mxu3 }
  0xab   :  { %647 = vst.msk [vmem:[%s1386_s3 + $0x10] sm:$0xf] %vm642_vm2, %v582_v42  ;;  %v445_v46 = vadd.f32 %v1061_v34, %v444_v44  ;;  %v485_v47 = vadd.f32 %v1061_v34, %v484_v45  ;;  %v366_v48 = vpop.f32.mrf.mxu0  ;;  %v406_v49 = vpop.f32.mrf.mxu1 }
  0xac   :  { %663 = vst.msk [vmem:[%s1386_s3 + $0x50] sm:$0xf] %vm642_vm2, %v598_v43  ;;  %v367_v50 = vadd.f32 %v1061_v34, %v366_v48  ;;  %v407_v51 = vadd.f32 %v1061_v34, %v406_v49 }
  0xad   :  { %v550_v52 = vmax.f32 %v445_v46, 0.0  ;;  %v566_v53 = vmax.f32 %v485_v47, 0.0 }
  0xae   :  { %v519_v54 = vmax.f32 %v367_v50, 0.0  ;;  %v535_v55 = vmax.f32 %v407_v51, 0.0 }
  0xaf   :  { %v614_v56 = vpack.c.bf16 %v550_v52, %v550_v52  ;;  %v630_v57 = vpack.c.bf16 %v566_v53, %v566_v53 }
  0xb0   :  { %v583_v58 = vpack.c.bf16 %v519_v54, %v519_v54  ;;  %v599_v59 = vpack.c.bf16 %v535_v55, %v535_v55 }
  0xb1   :  { %679 = vst.msk [vmem:[%s1386_s3 + $0x90] sm:$0xf] %vm642_vm2, %v614_v56 }
  0xb2   :  { %695 = vst.msk [vmem:[%s1386_s3 + $0xd0] sm:$0xf] %vm642_vm2, %v630_v57  ;;  %v446_v60 = vpop.f32.mrf.mxu2  ;;  %v486_v61 = vpop.f32.mrf.mxu3 }
  0xb3   :  { %648 = vst.msk [vmem:[%s1386_s3 + $0x14] sm:$0xf] %vm642_vm2, %v583_v58  ;;  %v447_v62 = vadd.f32 %v1061_v34, %v446_v60  ;;  %v487_v63 = vadd.f32 %v1061_v34, %v486_v61  ;;  %v369_v0 = vpop.f32.mrf.mxu0  ;;  %v409_v1 = vpop.f32.mrf.mxu1 }
  0xb4   :  { %664 = vst.msk [vmem:[%s1386_s3 + $0x54] sm:$0xf] %vm642_vm2, %v599_v59  ;;  %v370_v2 = vadd.f32 %v1061_v34, %v369_v0  ;;  %v410_v3 = vadd.f32 %v1061_v34, %v409_v1 }
  0xb5   :  { %v551_v4 = vmax.f32 %v447_v62, 0.0  ;;  %v567_v5 = vmax.f32 %v487_v63, 0.0 }
  0xb6   :  { %v520_v6 = vmax.f32 %v370_v2, 0.0  ;;  %v536_v7 = vmax.f32 %v410_v3, 0.0 }
  0xb7   :  { %v615_v8 = vpack.c.bf16 %v551_v4, %v551_v4  ;;  %v631_v9 = vpack.c.bf16 %v567_v5, %v567_v5 }
  0xb8   :  { %v584_v10 = vpack.c.bf16 %v520_v6, %v520_v6  ;;  %v600_v11 = vpack.c.bf16 %v536_v7, %v536_v7 }
  0xb9   :  { %680 = vst.msk [vmem:[%s1386_s3 + $0x94] sm:$0xf] %vm642_vm2, %v615_v8 }
  0xba   :  { %696 = vst.msk [vmem:[%s1386_s3 + $0xd4] sm:$0xf] %vm642_vm2, %v631_v9  ;;  %v449_v12 = vpop.f32.mrf.mxu2  ;;  %v489_v13 = vpop.f32.mrf.mxu3 }
  0xbb   :  { %649 = vst.msk [vmem:[%s1386_s3 + $0x18] sm:$0xf] %vm642_vm2, %v584_v10  ;;  %v450_v14 = vadd.f32 %v1061_v34, %v449_v12  ;;  %v490_v15 = vadd.f32 %v1061_v34, %v489_v13  ;;  %v371_v16 = vpop.f32.mrf.mxu0  ;;  %v411_v17 = vpop.f32.mrf.mxu1 }
  0xbc   :  { %665 = vst.msk [vmem:[%s1386_s3 + $0x58] sm:$0xf] %vm642_vm2, %v600_v11  ;;  %v372_v18 = vadd.f32 %v1061_v34, %v371_v16  ;;  %v412_v19 = vadd.f32 %v1061_v34, %v411_v17 }
  0xbd   :  { %v552_v20 = vmax.f32 %v450_v14, 0.0  ;;  %v568_v21 = vmax.f32 %v490_v15, 0.0 }
  0xbe   :  { %v521_v22 = vmax.f32 %v372_v18, 0.0  ;;  %v537_v23 = vmax.f32 %v412_v19, 0.0 }
  0xbf   :  { %v616_v24 = vpack.c.bf16 %v552_v20, %v552_v20  ;;  %v632_v25 = vpack.c.bf16 %v568_v21, %v568_v21 }
  0xc0   :  { %v585_v26 = vpack.c.bf16 %v521_v22, %v521_v22  ;;  %v601_v27 = vpack.c.bf16 %v537_v23, %v537_v23 }
  0xc1   :  { %681 = vst.msk [vmem:[%s1386_s3 + $0x98] sm:$0xf] %vm642_vm2, %v616_v24 }
  0xc2   :  { %697 = vst.msk [vmem:[%s1386_s3 + $0xd8] sm:$0xf] %vm642_vm2, %v632_v25  ;;  %v451_v28 = vpop.f32.mrf.mxu2  ;;  %v491_v29 = vpop.f32.mrf.mxu3 }
  0xc3   :  { %650 = vst.msk [vmem:[%s1386_s3 + $0x1c] sm:$0xf] %vm642_vm2, %v585_v26  ;;  %v452_v30 = vadd.f32 %v1061_v34, %v451_v28  ;;  %v492_v31 = vadd.f32 %v1061_v34, %v491_v29  ;;  %v374_v32 = vpop.f32.mrf.mxu0  ;;  %v414_v33 = vpop.f32.mrf.mxu1 }
  0xc4   :  { %666 = vst.msk [vmem:[%s1386_s3 + $0x5c] sm:$0xf] %vm642_vm2, %v601_v27  ;;  %v375_v35 = vadd.f32 %v1061_v34, %v374_v32  ;;  %v415_v36 = vadd.f32 %v1061_v34, %v414_v33 }
  0xc5   :  { %v553_v37 = vmax.f32 %v452_v30, 0.0  ;;  %v569_v38 = vmax.f32 %v492_v31, 0.0 }
  0xc6   :  { %v522_v39 = vmax.f32 %v375_v35, 0.0  ;;  %v538_v40 = vmax.f32 %v415_v36, 0.0 }
  0xc7   :  { %v617_v41 = vpack.c.bf16 %v553_v37, %v553_v37  ;;  %v633_v42 = vpack.c.bf16 %v569_v38, %v569_v38 }
  0xc8   :  { %v586_v43 = vpack.c.bf16 %v522_v39, %v522_v39  ;;  %v602_v44 = vpack.c.bf16 %v538_v40, %v538_v40 }
  0xc9   :  { %682 = vst.msk [vmem:[%s1386_s3 + $0x9c] sm:$0xf] %vm642_vm2, %v617_v41 }
  0xca   :  { %698 = vst.msk [vmem:[%s1386_s3 + $0xdc] sm:$0xf] %vm642_vm2, %v633_v42  ;;  %v454_v45 = vpop.f32.mrf.mxu2  ;;  %v494_v46 = vpop.f32.mrf.mxu3 }
  0xcb   :  { %651 = vst.msk [vmem:[%s1386_s3 + $0x20] sm:$0xf] %vm642_vm2, %v586_v43  ;;  %v455_v47 = vadd.f32 %v1061_v34, %v454_v45  ;;  %v495_v48 = vadd.f32 %v1061_v34, %v494_v46  ;;  %v376_v49 = vpop.f32.mrf.mxu0  ;;  %v416_v50 = vpop.f32.mrf.mxu1 }
  0xcc   :  { %667 = vst.msk [vmem:[%s1386_s3 + $0x60] sm:$0xf] %vm642_vm2, %v602_v44  ;;  %v377_v51 = vadd.f32 %v1061_v34, %v376_v49  ;;  %v417_v52 = vadd.f32 %v1061_v34, %v416_v50 }
  0xcd   :  { %v554_v53 = vmax.f32 %v455_v47, 0.0  ;;  %v570_v54 = vmax.f32 %v495_v48, 0.0 }
  0xce   :  { %v523_v55 = vmax.f32 %v377_v51, 0.0  ;;  %v539_v56 = vmax.f32 %v417_v52, 0.0 }
  0xcf   :  { %v618_v57 = vpack.c.bf16 %v554_v53, %v554_v53  ;;  %v634_v58 = vpack.c.bf16 %v570_v54, %v570_v54 }
  0xd0   :  { %v587_v59 = vpack.c.bf16 %v523_v55, %v523_v55  ;;  %v603_v60 = vpack.c.bf16 %v539_v56, %v539_v56 }
  0xd1   :  { %683 = vst.msk [vmem:[%s1386_s3 + $0xa0] sm:$0xf] %vm642_vm2, %v618_v57 }
  0xd2   :  { %699 = vst.msk [vmem:[%s1386_s3 + $0xe0] sm:$0xf] %vm642_vm2, %v634_v58  ;;  %v456_v61 = vpop.f32.mrf.mxu2  ;;  %v496_v62 = vpop.f32.mrf.mxu3 }
  0xd3   :  { %652 = vst.msk [vmem:[%s1386_s3 + $0x24] sm:$0xf] %vm642_vm2, %v587_v59  ;;  %v457_v63 = vadd.f32 %v1061_v34, %v456_v61  ;;  %v497_v0 = vadd.f32 %v1061_v34, %v496_v62  ;;  %v379_v1 = vpop.f32.mrf.mxu0  ;;  %v419_v2 = vpop.f32.mrf.mxu1 }
  0xd4   :  { %668 = vst.msk [vmem:[%s1386_s3 + $0x64] sm:$0xf] %vm642_vm2, %v603_v60  ;;  %v380_v3 = vadd.f32 %v1061_v34, %v379_v1  ;;  %v420_v4 = vadd.f32 %v1061_v34, %v419_v2 }
  0xd5   :  { %v555_v5 = vmax.f32 %v457_v63, 0.0  ;;  %v571_v6 = vmax.f32 %v497_v0, 0.0 }
  0xd6   :  { %v524_v7 = vmax.f32 %v380_v3, 0.0  ;;  %v540_v8 = vmax.f32 %v420_v4, 0.0 }
  0xd7   :  { %v619_v9 = vpack.c.bf16 %v555_v5, %v555_v5  ;;  %v635_v10 = vpack.c.bf16 %v571_v6, %v571_v6 }
  0xd8   :  { %v588_v11 = vpack.c.bf16 %v524_v7, %v524_v7  ;;  %v604_v12 = vpack.c.bf16 %v540_v8, %v540_v8 }
  0xd9   :  { %684 = vst.msk [vmem:[%s1386_s3 + $0xa4] sm:$0xf] %vm642_vm2, %v619_v9 }
  0xda   :  { %700 = vst.msk [vmem:[%s1386_s3 + $0xe4] sm:$0xf] %vm642_vm2, %v635_v10  ;;  %v459_v13 = vpop.f32.mrf.mxu2  ;;  %v499_v14 = vpop.f32.mrf.mxu3 }
  0xdb   :  { %653 = vst.msk [vmem:[%s1386_s3 + $0x28] sm:$0xf] %vm642_vm2, %v588_v11  ;;  %v460_v15 = vadd.f32 %v1061_v34, %v459_v13  ;;  %v500_v16 = vadd.f32 %v1061_v34, %v499_v14  ;;  %v381_v17 = vpop.f32.mrf.mxu0  ;;  %v421_v18 = vpop.f32.mrf.mxu1 }
  0xdc   :  { %669 = vst.msk [vmem:[%s1386_s3 + $0x68] sm:$0xf] %vm642_vm2, %v604_v12  ;;  %v382_v19 = vadd.f32 %v1061_v34, %v381_v17  ;;  %v422_v20 = vadd.f32 %v1061_v34, %v421_v18 }
  0xdd   :  { %v556_v21 = vmax.f32 %v460_v15, 0.0  ;;  %v572_v22 = vmax.f32 %v500_v16, 0.0 }
  0xde   :  { %v525_v23 = vmax.f32 %v382_v19, 0.0  ;;  %v541_v24 = vmax.f32 %v422_v20, 0.0 }
  0xdf   :  { %v620_v25 = vpack.c.bf16 %v556_v21, %v556_v21  ;;  %v636_v26 = vpack.c.bf16 %v572_v22, %v572_v22 }
  0xe0   :  { %v589_v27 = vpack.c.bf16 %v525_v23, %v525_v23  ;;  %v605_v28 = vpack.c.bf16 %v541_v24, %v541_v24 }
  0xe1   :  { %685 = vst.msk [vmem:[%s1386_s3 + $0xa8] sm:$0xf] %vm642_vm2, %v620_v25 }
  0xe2   :  { %701 = vst.msk [vmem:[%s1386_s3 + $0xe8] sm:$0xf] %vm642_vm2, %v636_v26  ;;  %v461_v29 = vpop.f32.mrf.mxu2  ;;  %v501_v30 = vpop.f32.mrf.mxu3 }
  0xe3   :  { %654 = vst.msk [vmem:[%s1386_s3 + $0x2c] sm:$0xf] %vm642_vm2, %v589_v27  ;;  %v462_v31 = vadd.f32 %v1061_v34, %v461_v29  ;;  %v502_v32 = vadd.f32 %v1061_v34, %v501_v30  ;;  %v384_v33 = vpop.f32.mrf.mxu0  ;;  %v424_v35 = vpop.f32.mrf.mxu1 }
  0xe4   :  { %670 = vst.msk [vmem:[%s1386_s3 + $0x6c] sm:$0xf] %vm642_vm2, %v605_v28  ;;  %v385_v36 = vadd.f32 %v1061_v34, %v384_v33  ;;  %v425_v37 = vadd.f32 %v1061_v34, %v424_v35 }
  0xe5   :  { %v557_v38 = vmax.f32 %v462_v31, 0.0  ;;  %v573_v39 = vmax.f32 %v502_v32, 0.0 }
  0xe6   :  { %v526_v40 = vmax.f32 %v385_v36, 0.0  ;;  %v542_v41 = vmax.f32 %v425_v37, 0.0 }
  0xe7   :  { %v621_v42 = vpack.c.bf16 %v557_v38, %v557_v38  ;;  %v637_v43 = vpack.c.bf16 %v573_v39, %v573_v39 }
  0xe8   :  { %v590_v44 = vpack.c.bf16 %v526_v40, %v526_v40  ;;  %v606_v45 = vpack.c.bf16 %v542_v41, %v542_v41 }
  0xe9   :  { %686 = vst.msk [vmem:[%s1386_s3 + $0xac] sm:$0xf] %vm642_vm2, %v621_v42 }
  0xea   :  { %702 = vst.msk [vmem:[%s1386_s3 + $0xec] sm:$0xf] %vm642_vm2, %v637_v43  ;;  %v464_v46 = vpop.f32.mrf.mxu2  ;;  %v504_v47 = vpop.f32.mrf.mxu3 }
  0xeb   :  { %655 = vst.msk [vmem:[%s1386_s3 + $0x30] sm:$0xf] %vm642_vm2, %v590_v44  ;;  %v465_v48 = vadd.f32 %v1061_v34, %v464_v46  ;;  %v505_v49 = vadd.f32 %v1061_v34, %v504_v47  ;;  %v386_v50 = vpop.f32.mrf.mxu0  ;;  %v426_v51 = vpop.f32.mrf.mxu1 }
  0xec   :  { %671 = vst.msk [vmem:[%s1386_s3 + $0x70] sm:$0xf] %vm642_vm2, %v606_v45  ;;  %v387_v52 = vadd.f32 %v1061_v34, %v386_v50  ;;  %v427_v53 = vadd.f32 %v1061_v34, %v426_v51 }
  0xed   :  { %v558_v54 = vmax.f32 %v465_v48, 0.0  ;;  %v574_v55 = vmax.f32 %v505_v49, 0.0 }
  0xee   :  { %v527_v56 = vmax.f32 %v387_v52, 0.0  ;;  %v543_v57 = vmax.f32 %v427_v53, 0.0 }
  0xef   :  { %v622_v58 = vpack.c.bf16 %v558_v54, %v558_v54  ;;  %v638_v59 = vpack.c.bf16 %v574_v55, %v574_v55 }
  0xf0   :  { %v591_v60 = vpack.c.bf16 %v527_v56, %v527_v56  ;;  %v607_v61 = vpack.c.bf16 %v543_v57, %v543_v57 }
  0xf1   :  { %687 = vst.msk [vmem:[%s1386_s3 + $0xb0] sm:$0xf] %vm642_vm2, %v622_v58 }
  0xf2   :  { %703 = vst.msk [vmem:[%s1386_s3 + $0xf0] sm:$0xf] %vm642_vm2, %v638_v59  ;;  %v466_v62 = vpop.f32.mrf.mxu2  ;;  %v506_v63 = vpop.f32.mrf.mxu3 }
  0xf3   :  { %656 = vst.msk [vmem:[%s1386_s3 + $0x34] sm:$0xf] %vm642_vm2, %v591_v60  ;;  %v467_v0 = vadd.f32 %v1061_v34, %v466_v62  ;;  %v507_v1 = vadd.f32 %v1061_v34, %v506_v63  ;;  %v389_v2 = vpop.f32.mrf.mxu0  ;;  %v429_v3 = vpop.f32.mrf.mxu1 }
  0xf4   :  { %672 = vst.msk [vmem:[%s1386_s3 + $0x74] sm:$0xf] %vm642_vm2, %v607_v61  ;;  %v390_v4 = vadd.f32 %v1061_v34, %v389_v2  ;;  %v430_v5 = vadd.f32 %v1061_v34, %v429_v3 }
  0xf5   :  { %v559_v6 = vmax.f32 %v467_v0, 0.0  ;;  %v575_v7 = vmax.f32 %v507_v1, 0.0 }
  0xf6   :  { %v528_v8 = vmax.f32 %v390_v4, 0.0  ;;  %v544_v9 = vmax.f32 %v430_v5, 0.0 }
  0xf7   :  { %v623_v10 = vpack.c.bf16 %v559_v6, %v559_v6  ;;  %v639_v11 = vpack.c.bf16 %v575_v7, %v575_v7 }
  0xf8   :  { %v592_v12 = vpack.c.bf16 %v528_v8, %v528_v8  ;;  %v608_v13 = vpack.c.bf16 %v544_v9, %v544_v9 }
  0xf9   :  { %688 = vst.msk [vmem:[%s1386_s3 + $0xb4] sm:$0xf] %vm642_vm2, %v623_v10 }
  0xfa   :  { %704 = vst.msk [vmem:[%s1386_s3 + $0xf4] sm:$0xf] %vm642_vm2, %v639_v11  ;;  %v469_v14 = vpop.f32.mrf.mxu2  ;;  %v509_v15 = vpop.f32.mrf.mxu3 }
  0xfb   :  { %657 = vst.msk [vmem:[%s1386_s3 + $0x38] sm:$0xf] %vm642_vm2, %v592_v12  ;;  %v470_v16 = vadd.f32 %v1061_v34, %v469_v14  ;;  %v510_v17 = vadd.f32 %v1061_v34, %v509_v15  ;;  %v391_v18 = vpop.f32.mrf.mxu0  ;;  %v431_v19 = vpop.f32.mrf.mxu1 }
  0xfc   :  { %673 = vst.msk [vmem:[%s1386_s3 + $0x78] sm:$0xf] %vm642_vm2, %v608_v13  ;;  %v392_v20 = vadd.f32 %v1061_v34, %v391_v18  ;;  %v432_v21 = vadd.f32 %v1061_v34, %v431_v19 }
  0xfd   :  { %v560_v22 = vmax.f32 %v470_v16, 0.0  ;;  %v576_v23 = vmax.f32 %v510_v17, 0.0 }
  0xfe   :  { %v529_v24 = vmax.f32 %v392_v20, 0.0  ;;  %v545_v25 = vmax.f32 %v432_v21, 0.0 }
  0xff   :  { %v624_v26 = vpack.c.bf16 %v560_v22, %v560_v22  ;;  %v640_v27 = vpack.c.bf16 %v576_v23, %v576_v23 }
 0x100   :  { %v593_v28 = vpack.c.bf16 %v529_v24, %v529_v24  ;;  %v609_v29 = vpack.c.bf16 %v545_v25, %v545_v25 }
 0x101   :  { %689 = vst.msk [vmem:[%s1386_s3 + $0xb8] sm:$0xf] %vm642_vm2, %v624_v26 }
 0x102   :  { %705 = vst.msk [vmem:[%s1386_s3 + $0xf8] sm:$0xf] %vm642_vm2, %v640_v27  ;;  %v471_v30 = vpop.f32.mrf.mxu2  ;;  %v511_v31 = vpop.f32.mrf.mxu3 }
 0x103   :  { %658 = vst.msk [vmem:[%s1386_s3 + $0x3c] sm:$0xf] %vm642_vm2, %v593_v28  ;;  %v472_v32 = vadd.f32 %v1061_v34, %v471_v30  ;;  %v512_v33 = vadd.f32 %v1061_v34, %v511_v31 }
 0x104   :  { %674 = vst.msk [vmem:[%s1386_s3 + $0x7c] sm:$0xf] %vm642_vm2, %v609_v29 }
 0x105   :  { %v561_v35 = vmax.f32 %v472_v32, 0.0  ;;  %v577_v36 = vmax.f32 %v512_v33, 0.0 }
 0x107   :  { %v625_v37 = vpack.c.bf16 %v561_v35, %v561_v35  ;;  %v641_v38 = vpack.c.bf16 %v577_v36, %v577_v36 }
 0x109   :  { %690 = vst.msk [vmem:[%s1386_s3 + $0xbc] sm:$0xf] %vm642_vm2, %v625_v37 }
 0x10a   :  { %706 = vst.msk [vmem:[%s1386_s3 + $0xfc] sm:$0xf] %vm642_vm2, %v641_v38 }

// kernel: bottleneck_forward.5
= control target key start
LH: loop header
LB: loop body
LE: loop exit
PB: predicated region body
PF: predicated region fallthrough
CT: control target
= control target key end

     0   :  { %vm111_vm0 = vcmask 1041408   ;;  %vm250_vm1 = vcmask 1043456   ;;  %vm86_vm2 = vcmask 31744   ;;  %vm225_vm3 = vcmask 64512   ;;  %s668_s0 = inlined_call_operand.vmem [shape: bf16[128,4], index: 0, kind: input, shape index: {}]   ;;  %s669_s1 = inlined_call_operand.vmem [shape: bf16[128,8], index: 1, kind: input, shape index: {}]   ;;  %s670_s2 = inlined_call_operand.vmem [shape: bf16[4,16], index: 2, kind: input, shape index: {}]   ;;  %s671_s3 = inlined_call_operand.vmem [shape: f32[1,16], index: 3, kind: input, shape index: {}]   ;;  %s672_s4 = inlined_call_operand.vmem [shape: bf16[8,16], index: 4, kind: input, shape index: {}]   ;;  %s673_s5 = inlined_call_operand.vmem [shape: f32[1,16], index: 5, kind: input, shape index: {}]   ;;  %s674_s6 = inlined_call_operand.hbm [shape: f32[128,16], index: 6, kind: output, shape index: {}]  }
   0x1   :  { %v41_v0 = vld [vmem:[%s670_s2] sm:$0x3] }
   0x2   :  { %v180_v1 = vld [vmem:[%s672_s4] sm:$0xf]  ;;  %v113_v2 = vsel %vm111_vm0, %v41_v0, 0 }
   0x3   :  { %v252_v3 = vsel %vm250_vm1, %v180_v1, 0  ;;  %v450_v4 = vld [vmem:[%s668_s0] sm:$0xff]  ;;  %122 = vmatpush.bf16.msra.mxu0 %v113_v2  ;;  %466 = vmatpush.bf16.msra.mxu2 %v113_v2 }
   0x4   :  { %v454_v5 = vld [vmem:[%s668_s0 + $0x20] sm:$0xff]  ;;  %261 = vmatpush.bf16.msra.mxu1 %v252_v3  ;;  %467 = vmatpush.bf16.msra.mxu3 %v252_v3 }
   0x5   :  { %v458_v6 = vld [vmem:[%s669_s1] sm:$0xff] }
   0x6   :  { %v462_v7 = vld [vmem:[%s669_s1 + $0x20] sm:$0xff]  ;;  %402 = vmatmul.msk.bf16.vlgmr.msra.gmra.mxu0 %vm86_vm2, %v450_v4  ;;  %406 = vmatmul.msk.bf16.vlgmr.msra.gmra.mxu2 %vm86_vm2, %v454_v5 }
   0x7   :  { %11 = vsyncpa [#allocation3], 0  ;;  %442 = vmatmul.msk.bf16.vlgmr.msra.gmra.mxu1 %vm225_vm3, %v458_v6  ;;  %446 = vmatmul.msk.bf16.vlgmr.msra.gmra.mxu3 %vm225_vm3, %v462_v7  ;;  %v451_v8 = vld [vmem:[%s668_s0 + $0x8] sm:$0xff]  ;;  %v452_v12 = vld [vmem:[%s668_s0 + $0x10] sm:$0xff]  ;;  %vm335_vm4 = vcmask 130048   ;;  %s358_s9 = sshll.u32 %s674_s6, 4  ;;  %s359_s9 = int_to_ptr.hbm [resolvable:$true] %s358_s9 }
   0x8   :  { %v455_v9 = vld [vmem:[%s668_s0 + $0x28] sm:$0xff]  ;;  %v456_v13 = vld [vmem:[%s668_s0 + $0x30] sm:$0xff]  ;;  %v453_v16 = vld [vmem:[%s668_s0 + $0x18] sm:$0xff]  ;;  %s500_s10 = smov 128   ;;  %s501_s11 = smov 8  }
   0x9   :  { %v459_v10 = vld [vmem:[%s669_s1 + $0x8] sm:$0xff]  ;;  %v460_v14 = vld [vmem:[%s669_s1 + $0x10] sm:$0xff]  ;;  %v457_v17 = vld [vmem:[%s668_s0 + $0x38] sm:$0xff] }
   0xa   :  { %v463_v11 = vld [vmem:[%s669_s1 + $0x28] sm:$0xff]  ;;  %v464_v15 = vld [vmem:[%s669_s1 + $0x30] sm:$0xff]  ;;  %v461_v18 = vld [vmem:[%s669_s1 + $0x18] sm:$0xff] }
   0xb   :  { %v465_v19 = vld [vmem:[%s669_s1 + $0x38] sm:$0xff]  ;;  %v610_v20 = vld [vmem:[%s671_s3] ss:$0 sm:$0xff]  ;;  %s499_s1 = smov [#allocation2]  }
   0xc   :  { %v615_v21 = vld [vmem:[%s673_s5] ss:$0 sm:$0xff]  ;;  %s356_s3 = sshll.u32 %s499_s1, 4  ;;  %s357_s3 = int_to_ptr.vmem [resolvable:$true] %s356_s3 }
  0x16   :  { %403 = vmatmul.msk.bf16.gmra.mxu0 %vm86_vm2, %v451_v8  ;;  %407 = vmatmul.msk.bf16.gmra.mxu2 %vm86_vm2, %v455_v9 }
  0x17   :  { %443 = vmatmul.msk.bf16.gmra.mxu1 %vm225_vm3, %v459_v10  ;;  %447 = vmatmul.msk.bf16.gmra.mxu3 %vm225_vm3, %v463_v11 }
  0x26   :  { %404 = vmatmul.msk.bf16.gmra.mxu0 %vm86_vm2, %v452_v12  ;;  %408 = vmatmul.msk.bf16.gmra.mxu2 %vm86_vm2, %v456_v13 }
  0x27   :  { %444 = vmatmul.msk.bf16.gmra.mxu1 %vm225_vm3, %v460_v14  ;;  %448 = vmatmul.msk.bf16.gmra.mxu3 %vm225_vm3, %v464_v15 }
  0x36   :  { %405 = vmatmul.msk.bf16.gmra.mxu0 %vm86_vm2, %v453_v16  ;;  %409 = vmatmul.msk.bf16.gmra.mxu2 %vm86_vm2, %v457_v17 }
  0x37   :  { %445 = vmatmul.msk.bf16.gmra.mxu1 %vm225_vm3, %v461_v18  ;;  %449 = vmatmul.msk.bf16.gmra.mxu3 %vm225_vm3, %v465_v19 }
  0x83   :  { %v124_v22 = vpop.f32.mrf.mxu0 }
  0x84   :  { %v125_v23 = vadd.f32 %v610_v20, %v124_v22  ;;  %v263_v24 = vpop.f32.mrf.mxu1 }
  0x85   :  { %v264_v25 = vadd.f32 %v615_v21, %v263_v24 }
  0x87   :  { %v303_v26 = vadd.f32 %v264_v25, %v125_v23 }
  0x89   :  { %v319_v27 = vmax.f32 %v303_v26, 0.0  ;;  %v144_v28 = vpop.f32.mrf.mxu2 }
  0x8a   :  { %v145_v29 = vadd.f32 %v610_v20, %v144_v28  ;;  %v283_v30 = vpop.f32.mrf.mxu3 }
  0x8b   :  { %336 = vst.msk [vmem:[#allocation2] sm:$0xff] %vm335_vm4, %v319_v27  ;;  %v284_v31 = vadd.f32 %v615_v21, %v283_v30  ;;  %v126_v32 = vpop.f32.mrf.mxu0 }
  0x8c   :  { %v127_v33 = vadd.f32 %v610_v20, %v126_v32  ;;  %v265_v34 = vpop.f32.mrf.mxu1 }
  0x8d   :  { %v311_v35 = vadd.f32 %v284_v31, %v145_v29  ;;  %v266_v36 = vadd.f32 %v615_v21, %v265_v34 }
  0x8f   :  { %v327_v37 = vmax.f32 %v311_v35, 0.0  ;;  %v304_v38 = vadd.f32 %v266_v36, %v127_v33 }
  0x91   :  { %344 = vst.msk [vmem:[#allocation2 + $0x40] sm:$0xff] %vm335_vm4, %v327_v37  ;;  %v320_v39 = vmax.f32 %v304_v38, 0.0  ;;  %v146_v40 = vpop.f32.mrf.mxu2 }
  0x92   :  { %v147_v41 = vadd.f32 %v610_v20, %v146_v40  ;;  %v285_v42 = vpop.f32.mrf.mxu3 }
  0x93   :  { %337 = vst.msk [vmem:[#allocation2 + $0x8] sm:$0xff] %vm335_vm4, %v320_v39  ;;  %v286_v43 = vadd.f32 %v615_v21, %v285_v42  ;;  %v129_v44 = vpop.f32.mrf.mxu0 }
  0x94   :  { %v130_v45 = vadd.f32 %v610_v20, %v129_v44  ;;  %v268_v46 = vpop.f32.mrf.mxu1 }
  0x95   :  { %v312_v47 = vadd.f32 %v286_v43, %v147_v41  ;;  %v269_v48 = vadd.f32 %v615_v21, %v268_v46 }
  0x97   :  { %v328_v49 = vmax.f32 %v312_v47, 0.0  ;;  %v305_v50 = vadd.f32 %v269_v48, %v130_v45 }
  0x99   :  { %345 = vst.msk [vmem:[#allocation2 + $0x48] sm:$0xff] %vm335_vm4, %v328_v49  ;;  %v321_v51 = vmax.f32 %v305_v50, 0.0  ;;  %v149_v52 = vpop.f32.mrf.mxu2 }
  0x9a   :  { %v150_v53 = vadd.f32 %v610_v20, %v149_v52  ;;  %v288_v54 = vpop.f32.mrf.mxu3 }
  0x9b   :  { %338 = vst.msk [vmem:[#allocation2 + $0x10] sm:$0xff] %vm335_vm4, %v321_v51  ;;  %v289_v55 = vadd.f32 %v615_v21, %v288_v54  ;;  %v131_v56 = vpop.f32.mrf.mxu0 }
  0x9c   :  { %v132_v57 = vadd.f32 %v610_v20, %v131_v56  ;;  %v270_v58 = vpop.f32.mrf.mxu1 }
  0x9d   :  { %v313_v59 = vadd.f32 %v289_v55, %v150_v53  ;;  %v271_v60 = vadd.f32 %v615_v21, %v270_v58 }
  0x9f   :  { %v329_v61 = vmax.f32 %v313_v59, 0.0  ;;  %v306_v62 = vadd.f32 %v271_v60, %v132_v57 }
  0xa1   :  { %346 = vst.msk [vmem:[#allocation2 + $0x50] sm:$0xff] %vm335_vm4, %v329_v61  ;;  %v322_v63 = vmax.f32 %v306_v62, 0.0  ;;  %v151_v0 = vpop.f32.mrf.mxu2 }
  0xa2   :  { %v152_v1 = vadd.f32 %v610_v20, %v151_v0  ;;  %v290_v2 = vpop.f32.mrf.mxu3 }
  0xa3   :  { %339 = vst.msk [vmem:[#allocation2 + $0x18] sm:$0xff] %vm335_vm4, %v322_v63  ;;  %v291_v3 = vadd.f32 %v615_v21, %v290_v2  ;;  %v134_v4 = vpop.f32.mrf.mxu0 }
  0xa4   :  { %v135_v5 = vadd.f32 %v610_v20, %v134_v4  ;;  %v273_v6 = vpop.f32.mrf.mxu1 }
  0xa5   :  { %v314_v7 = vadd.f32 %v291_v3, %v152_v1  ;;  %v274_v8 = vadd.f32 %v615_v21, %v273_v6 }
  0xa7   :  { %v330_v9 = vmax.f32 %v314_v7, 0.0  ;;  %v307_v10 = vadd.f32 %v274_v8, %v135_v5 }
  0xa9   :  { %347 = vst.msk [vmem:[#allocation2 + $0x58] sm:$0xff] %vm335_vm4, %v330_v9  ;;  %v323_v11 = vmax.f32 %v307_v10, 0.0  ;;  %v154_v12 = vpop.f32.mrf.mxu2 }
  0xaa   :  { %v155_v13 = vadd.f32 %v610_v20, %v154_v12  ;;  %v293_v14 = vpop.f32.mrf.mxu3 }
  0xab   :  { %340 = vst.msk [vmem:[#allocation2 + $0x20] sm:$0xff] %vm335_vm4, %v323_v11  ;;  %v294_v15 = vadd.f32 %v615_v21, %v293_v14  ;;  %v136_v16 = vpop.f32.mrf.mxu0 }
  0xac   :  { %v137_v17 = vadd.f32 %v610_v20, %v136_v16  ;;  %v275_v18 = vpop.f32.mrf.mxu1 }
  0xad   :  { %v315_v19 = vadd.f32 %v294_v15, %v155_v13  ;;  %v276_v22 = vadd.f32 %v615_v21, %v275_v18 }
  0xaf   :  { %v331_v23 = vmax.f32 %v315_v19, 0.0  ;;  %v308_v24 = vadd.f32 %v276_v22, %v137_v17 }
  0xb1   :  { %348 = vst.msk [vmem:[#allocation2 + $0x60] sm:$0xff] %vm335_vm4, %v331_v23  ;;  %v324_v25 = vmax.f32 %v308_v24, 0.0  ;;  %v156_v26 = vpop.f32.mrf.mxu2 }
  0xb2   :  { %v157_v27 = vadd.f32 %v610_v20, %v156_v26  ;;  %v295_v28 = vpop.f32.mrf.mxu3 }
  0xb3   :  { %341 = vst.msk [vmem:[#allocation2 + $0x28] sm:$0xff] %vm335_vm4, %v324_v25  ;;  %v296_v29 = vadd.f32 %v615_v21, %v295_v28  ;;  %v139_v30 = vpop.f32.mrf.mxu0 }
  0xb4   :  { %v140_v31 = vadd.f32 %v610_v20, %v139_v30  ;;  %v278_v32 = vpop.f32.mrf.mxu1 }
  0xb5   :  { %v316_v33 = vadd.f32 %v296_v29, %v157_v27  ;;  %v279_v34 = vadd.f32 %v615_v21, %v278_v32 }
  0xb7   :  { %v332_v35 = vmax.f32 %v316_v33, 0.0  ;;  %v309_v36 = vadd.f32 %v279_v34, %v140_v31 }
  0xb9   :  { %349 = vst.msk [vmem:[#allocation2 + $0x68] sm:$0xff] %vm335_vm4, %v332_v35  ;;  %v325_v37 = vmax.f32 %v309_v36, 0.0  ;;  %v159_v38 = vpop.f32.mrf.mxu2 }
  0xba   :  { %v160_v39 = vadd.f32 %v610_v20, %v159_v38  ;;  %v298_v40 = vpop.f32.mrf.mxu3 }
  0xbb   :  { %342 = vst.msk [vmem:[#allocation2 + $0x30] sm:$0xff] %vm335_vm4, %v325_v37  ;;  %v299_v41 = vadd.f32 %v615_v21, %v298_v40  ;;  %v141_v42 = vpop.f32.mrf.mxu0 }
  0xbc   :  { %v142_v43 = vadd.f32 %v610_v20, %v141_v42  ;;  %v280_v44 = vpop.f32.mrf.mxu1 }
  0xbd   :  { %v317_v45 = vadd.f32 %v299_v41, %v160_v39  ;;  %v281_v46 = vadd.f32 %v615_v21, %v280_v44 }
  0xbf   :  { %v333_v47 = vmax.f32 %v317_v45, 0.0  ;;  %v310_v48 = vadd.f32 %v281_v46, %v142_v43 }
  0xc1   :  { %350 = vst.msk [vmem:[#allocation2 + $0x70] sm:$0xff] %vm335_vm4, %v333_v47  ;;  %v326_v49 = vmax.f32 %v310_v48, 0.0  ;;  %v161_v50 = vpop.f32.mrf.mxu2 }
  0xc2   :  { %v162_v51 = vadd.f32 %v610_v20, %v161_v50  ;;  %v300_v52 = vpop.f32.mrf.mxu3 }
  0xc3   :  { %343 = vst.msk [vmem:[#allocation2 + $0x38] sm:$0xff] %vm335_vm4, %v326_v49  ;;  %v301_v53 = vadd.f32 %v615_v21, %v300_v52 }
  0xc5   :  { %v318_v54 = vadd.f32 %v301_v53, %v162_v51 }
  0xc7   :  { %v334_v55 = vmax.f32 %v318_v54, 0.0 }
  0xc9   :  { %351 = vst.msk [vmem:[#allocation2 + $0x78] sm:$0xff] %vm335_vm4, %v334_v55 }
  0xca   :  { %364 = dma.vmem_to_hbm [thread:$0]  %s357_s3, 2048, %s359_s9, [#allocation3], %s500_s10, %s500_s10, %s501_s11  }
  0xcb   :  { %497 = dma.done.wait [#allocation3], 2048  }
  0xcc   :  { %498 = vsyncadd [#allocation3], 4294965248 }
  0xcd   :  { %369 = vsyncpa [#allocation3], 1 }

// kernel: bottleneck_forward.4
= control target key start
LH: loop header
LB: loop body
LE: loop exit
PB: predicated region body
PF: predicated region fallthrough
CT: control target
= control target key end

     0   :  { %s1707_s12 = smov 0   ;;  %s1968_s0 = inlined_call_operand.vmem [shape: bf16[2,4,90,4], index: 0, kind: input, shape index: {}]   ;;  %s1969_s1 = inlined_call_operand.vmem [shape: bf16[9,4,4], index: 1, kind: input, shape index: {}]   ;;  %s1970_s2 = inlined_call_operand.vmem [shape: f32[1,4], index: 2, kind: input, shape index: {}]   ;;  %s1971_s3 = inlined_call_operand.vmem [shape: bf16[2,8,8,4], index: 3, kind: output, shape index: {}]  }
   0x1 LB: > { %s1366_s13 = sadd.s32 4294967295, %s1685_s12   ;;  %p1370_p0 = scmp.ge.s32.totalorder %s1685_s12, 1  ;;  %s1685_s12 = sphi %s1707_s12, %s13_s12  }
   0x2   : > { %p137_p1 = scmp.lt.s32.totalorder %s1685_s12, 3 }
   0x4   : > { %p138_p2 = pnand %p1370_p0, %p137_p1 }
   0x5   : > { %p161_p3 = scmp.lt.s32.totalorder (!%p138_p2), %s1366_s13, 1 }
   0x6   : > { %141 = sbr.rel (%p138_p2) target bundleno = 347 (0x15b), region = 32 }
   0xb   : > { %v1383_v0 = vld [vmem:[%s1969_s1 + $0x2] sm:$0x3]  ;;  %vm233_vm0 = vcmask 1041408   ;;  %v1426_v2 = vld [vmem:[%s1969_s1 + $0x4] sm:$0x3]  ;;  %s1973_s13 = smov (!%p161_p3, %s1366_s13), 1 }
   0xc   : > { %v235_v1 = vsel %vm233_vm0, %v1383_v0, 0  ;;  %v181_v3 = vld [vmem:[%s1969_s1] sm:$0x3]  ;;  %v437_v4 = vsel %vm233_vm0, %v1426_v2, 0  ;;  %v1461_v6 = vld [vmem:[%s1969_s1 + $0x6] sm:$0x3] }
   0xd   : > { %1663 = vmatpush.bf16.msra.mxu1 %v235_v1  ;;  %1664 = vmatpush.bf16.msra.mxu2 %v235_v1  ;;  %v309_v5 = vsel %vm233_vm0, %v181_v3, 0  ;;  %v532_v7 = vsel %vm233_vm0, %v1461_v6, 0  ;;  %v1492_v8 = vld [vmem:[%s1969_s1 + $0x8] sm:$0x3]  ;;  %s1666_s24 = smul.u32 192, %s1973_s13  ;;  %vm217_vm1 = vcmask 31744  }
   0xe   : > { %1665 = vmatpush.bf16.msra.mxu3 %v235_v1  ;;  %244 = vmatpush.bf16.msra.mxu0 %v235_v1  ;;  %v627_v9 = vsel %vm233_vm0, %v1492_v8, 0  ;;  %v1550_v16 = vld [vmem:[%s1969_s1 + $0xc] sm:$0x3]  ;;  %v1582_v18 = vld [vmem:[%s1969_s1 + $0xe] sm:$0x3]  ;;  %vm1085_vm3 = vcmask 1046528  }
   0xf   : > { %s1741_s27 = scalar_lea.vmem %s1968_s0, %s1666_s24  ;;  %v899_v17 = vsel %vm233_vm0, %v1550_v16, 0  ;;  %v1035_v19 = vsel %vm233_vm0, %v1582_v18, 0  ;;  %v1524_v20 = vld [vmem:[%s1969_s1 + $0xa] sm:$0x3]  ;;  %v1608_v21 = vld [vmem:[%s1969_s1 + $0x10] sm:$0x3] }
  0x10   : > { %v1633_v10 = vld [vmem:[%s1741_s27 + $0x38] sm:$0xff]  ;;  %v1634_v11 = vld [vmem:[%s1741_s27 + $0x40] sm:$0xff]  ;;  %v1382_v12 = vld [vmem:[%s1741_s27 + $0x50] sm:$0xf]  ;;  %v763_v22 = vsel %vm233_vm0, %v1524_v20, 0  ;;  %v1111_v23 = vsel %vm233_vm0, %v1608_v21, 0 }
  0x11   : > { %446 = vmatpush.bf16.msrb.mxu2 %v437_v4  ;;  %318 = vmatpush.bf16.msrb.mxu1 %v309_v5  ;;  %v211_v13 = vunpack.c.l.b16 %v1382_v12  ;;  %v1632_v14 = vld [vmem:[%s1741_s27 + $0x30] sm:$0xff]  ;;  %v1635_v24 = vld [vmem:[%s1741_s27 + $0x48] sm:$0xff]  ;;  %v1628_v25 = vld [vmem:[%s1741_s27] sm:$0xff]  ;;  %vm381_vm2 = vsmask.f32 7424  ;;  %s1627_s11 = sshll.u32 %s1973_s13, 5 }
  0x12   : > { %541 = vmatpush.bf16.msrb.mxu3 %v532_v7  ;;  %636 = vmatpush.bf16.msrb.mxu0 %v627_v9  ;;  %v1636_v26 = vld [vmem:[%s1741_s27] sm:$0xff]  ;;  %v1645_v27 = vld [vmem:[%s1741_s27 + $0x90] sm:$0xff]  ;;  %v1637_v29 = vld [vmem:[%s1741_s27 + $0x8] sm:$0xff]  ;;  %s1919_s16 = scalar_lea.vmem %s1971_s3, %s1627_s11  ;;  %vm1178_vm4 = vcmask 27648   ;;  %vm1182_vm5 = vsmask.f32 3328 }
  0x13   : > { %1401 = vmatmul.msk.bf16.vlgmr.msra.gmra.mxu1 %vm217_vm1, %v1633_v10  ;;  %1402 = vmatmul.msk.bf16.vlgmr.msra.gmra.mxu2 %vm217_vm1, %v1634_v11  ;;  %v216_v15 = vpack.c.b16 %v211_v13, %v211_v13  ;;  %v1641_v28 = vld [vmem:[%s1741_s27 + $0x60] sm:$0xff]  ;;  %v385_v30 = vshll.u32 %v1636_v26, 16  ;;  %v383_v31 = vshrl.u32 %v1636_v26, 16  ;;  %v390_v33 = vshll.u32 %v1637_v29, 16  ;;  %v1629_v36 = vld [vmem:[%s1741_s27 + $0x8] sm:$0xff]  ;;  %v1646_v38 = vld [vmem:[%s1741_s27 + $0x98] sm:$0xff] }
  0x14   : > { %1400 = vmatmul.msk.bf16.vlgmr.msra.gmra.mxu0 %vm217_vm1, %v1632_v14  ;;  %v1642_v39 = vld [vmem:[%s1741_s27 + $0x68] sm:$0xff]  ;;  %v1638_v40 = vld [vmem:[%s1741_s27 + $0x10] sm:$0xff]  ;;  %v394_v41 = vshrl.u32 %v1637_v29, 16  ;;  %v1647_v47 = vld [vmem:[%s1741_s27 + $0xa0] sm:$0xff]  ;;  %vm1183_vm6 = vsmask.f32 7440 }
  0x15   : > { %1404 = vmatmul.msk.bf16.vlgmr.msra.gmra.mxu3 %vm217_vm1, %v216_v15  ;;  %908 = vmatpush.bf16.msra.mxu2 %v899_v17  ;;  %v387_v32 = vrot.slane %v385_v30, 1  ;;  %v392_v35 = vrot.slane %v390_v33, 1  ;;  %v398_v42 = vshll.u32 %v1638_v40, 16  ;;  %v1630_v45 = vld [vmem:[%s1741_s27 + $0x10] sm:$0xff]  ;;  %v1639_v49 = vld [vmem:[%s1741_s27 + $0x18] sm:$0xff]  ;;  %v402_v50 = vshrl.u32 %v1638_v40, 16  ;;  %vm1184_vm7 = vmor %vm1182_vm5, %vm1183_vm6 }
  0x16   : > { %1044 = vmatpush.bf16.msra.mxu3 %v1035_v19  ;;  %772 = vmatpush.bf16.msra.mxu1 %v763_v22  ;;  %v1643_v48 = vld [vmem:[%s1741_s27 + $0x70] sm:$0xff]  ;;  %v406_v51 = vshll.u32 %v1639_v49, 16  ;;  %v1631_v54 = vld [vmem:[%s1741_s27 + $0x18] sm:$0xff]  ;;  %v1648_v56 = vld [vmem:[%s1741_s27 + $0xa8] sm:$0xff]  ;;  %v410_v62 = vshrl.u32 %v1639_v49, 16  ;;  %vm1205_vm8 = vcmask 1042432  }
  0x17   : > { %1120 = vmatpush.bf16.msra.mxu0 %v1111_v23  ;;  %v388_v34 = vor.u32 %v387_v32, %v383_v31  ;;  %v396_v43 = vor.u32 %v394_v41, %v392_v35  ;;  %v400_v44 = vrot.slane %v398_v42, 1  ;;  %v1445_v57 = vld [vmem:[%s1741_s27 + $0x20] sm:$0xf]  ;;  %v1640_v58 = vld [vmem:[%s1741_s27 + $0x20] sm:$0x10]  ;;  %v1644_v59 = vld [vmem:[%s1741_s27 + $0x78] sm:$0xff] }
  0x18   : > { %v408_v53 = vrot.slane %v406_v51, 1  ;;  %v1446_v60 = vor.u32 %v1640_v58, %v1445_v57  ;;  %v180_v61 = vld [vmem:[%s1741_s27 + $0x20] sm:$0xf]  ;;  %v1491_v0 = vld [vmem:[%s1741_s27 + $0xb0] sm:$0xf]  ;;  %v1658_v13 = vld [vmem:[%s1741_s27 + $0x34] sm:$0xff] }
  0x19   : > { %v393_v37 = vsel %vm381_vm2, %v388_v34, %v392_v35  ;;  %v401_v46 = vsel %vm381_vm2, %v396_v43, %v400_v44  ;;  %v404_v52 = vor.u32 %v402_v50, %v400_v44  ;;  %v287_v1 = vunpack.c.l.b16 %v180_v61  ;;  %v1460_v2 = vld [vmem:[%s1741_s27 + $0x80] sm:$0xf]  ;;  %v1681_v12 = vld [vmem:[%s1741_s27 + $0x4] sm:$0xe]  ;;  %v1650_v14 = vld [vmem:[%s1741_s27 + $0x68] sm:$0xff] }
  0x1a   : > { %v414_v63 = vshll.u32 %v1446_v60, 16  ;;  %v412_v3 = vor.u32 %v410_v62, %v408_v53  ;;  %v605_v5 = vunpack.c.l.b16 %v1491_v0  ;;  %v510_v6 = vunpack.c.l.b16 %v1460_v2  ;;  %v1649_v9 = vld [vmem:[%s1741_s27 + $0x60] sm:$0xff]  ;;  %v1680_v17 = vld [vmem:[%s1741_s27 + $0x4] sm:$0xf0]  ;;  %v1831_v49 = vld [vmem:[%s1741_s27 + $0x14] sm:$0xff] }
  0x1b   : > { %v409_v55 = vsel %vm381_vm2, %v404_v52, %v408_v53  ;;  %v292_v7 = vpack.c.b16 %v287_v1, %v287_v1  ;;  %v711_v15 = vshll.u32 %v1649_v9, 16  ;;  %v807_v16 = vld [vmem:[%s1741_s27 + $0x4] sm:$0xff]   ;;  %v1659_v18 = vld [vmem:[%s1741_s27 + $0x3c] sm:$0xff]  ;;  %v983_v19 = vshll.u32 %v1658_v13, 16  ;;  %v1661_v62 = vld [vmem:[%s1741_s27 + $0x4c] sm:$0xff] }
  0x1c   : > { %v416_v4 = vrot.slane %v414_v63, 1  ;;  %v610_v10 = vpack.c.b16 %v605_v5, %v605_v5  ;;  %v515_v11 = vpack.c.b16 %v510_v6, %v510_v6  ;;  %v709_v20 = vshrl.u32 %v1649_v9, 16  ;;  %v1660_v42 = vld [vmem:[%s1741_s27 + $0x44] sm:$0xff]  ;;  %v1652_v61 = vld [vmem:[%s1741_s27 + $0x78] sm:$0xff] }
  0x1d   : > { %v713_v21 = vrot.slane %v711_v15, 1  ;;  %v716_v22 = vshll.u32 %v1650_v14, 16  ;;  %v1682_v23 = vor.u32 %v1681_v12, %v1680_v17  ;;  %v985_v26 = vrot.slane %v983_v19, 1  ;;  %v1846_v5 = vld [vmem:[%s1741_s27 + $0x1c] sm:$0xff]  ;;  %v1653_v17 = vld [vmem:[%s1741_s27 + $0x80] sm:$0x10] }
  0x1e   : > { %v417_v8 = vsel %vm381_vm2, %v412_v3, %v416_v4  ;;  %v847_v40 = vshll.u32 %v807_v16, 16  ;;  %v720_v41 = vshrl.u32 %v1650_v14, 16  ;;  %v845_v44 = vshrl.u32 %v807_v16, 16  ;;  %v1543_v16 = vld [vmem:[%s1741_s27 + $0x80] sm:$0xf] }
  0x1f   : > { %v714_v29 = vor.u32 %v713_v21, %v709_v20  ;;  %v718_v30 = vrot.slane %v716_v22, 1  ;;  %v1086_v31 = vrot.slane %v1682_v23, 1  ;;  %v732_v0 = vshll.u32 %v1652_v61, 16  ;;  %v1601_v22 = vld [vmem:[%s1741_s27 + $0x54] sm:$0xf] }
  0x20   : > { %v860_v2 = vshll.u32 %v1831_v49, 16  ;;  %v1000_v3 = vshrl.u32 %v1660_v42, 16  ;;  %v1544_v21 = vor.u32 %v1653_v17, %v1543_v16  ;;  %v1662_v23 = vld [vmem:[%s1741_s27 + $0x54] sm:$0x10]  ;;  %vm1206_vm9 = vcmask 1046532  }
  0x21   : > { %v722_v50 = vor.u32 %v720_v41, %v718_v30  ;;  %vm1207_vm10 = vmor %vm1205_vm8, %vm1206_vm9  ;;  %vm1216_vm11 = vsmask.f32 2304  ;;  %vm1217_vm12 = vsmask.f32 6416  ;;  %vm1244_vm14 = vcmask 1045508  }
  0x22   : > { %v862_v9 = vrot.slane %v860_v2, 1  ;;  %vm1218_vm13 = vmor %vm1216_vm11, %vm1217_vm12  ;;  %vm1282_vm5 = vcmask 1044484   ;;  %vm1293_vm8 = vsmask.f32 4368 }
  0x23   : > { %1403 = vmatmul.msk.bf16.gmra.mxu2 %vm217_vm1, %v1635_v24  ;;  %1421 = vmatmul.msk.bf16.vlgmr.msrb.gmra.mxu1 %vm217_vm1, %v1628_v25  ;;  %v418_v24 = vshrl.u32 %v1446_v60, 16  ;;  %v981_v25 = vshrl.u32 %v1658_v13, 16  ;;  %vm1245_vm15 = vmor %vm233_vm0, %vm1244_vm14  ;;  %vm1254_vm0 = vsmask.f32 1280 }
  0x24   : > { %1509 = vmatmul.msk.bf16.vlgmr.msrb.gmra.mxu0 %vm217_vm1, %v1645_v27  ;;  %v988_v27 = vshll.u32 %v1659_v18, 16 }
  0x25   : > { %1478 = vmatmul.msk.bf16.vlgmr.msrb.gmra.mxu3 %vm217_vm1, %v1641_v28  ;;  %v1654_v28 = vld [vmem:[%s1741_s27 + $0xc] sm:$0xff]  ;;  %v420_v33 = vor.u32 %v418_v24, %v416_v4  ;;  %v986_v34 = vor.u32 %v985_v26, %v981_v25  ;;  %v1004_v4 = vshll.u32 %v1661_v62, 16  ;;  %v736_v25 = vshrl.u32 %v1652_v61, 16 }
  0x26   : > { %v1087_v32 = vrot.slane %v1654_v28, 1  ;;  %v990_v35 = vrot.slane %v988_v27, 1  ;;  %v856_v1 = vshrl.u32 %v1654_v28, 16  ;;  %v740_v26 = vshll.u32 %v1544_v21, 16 }
  0x27   : > { %v1006_v12 = vrot.slane %v1004_v4, 1  ;;  %v1602_v27 = vor.u32 %v1662_v23, %v1601_v22  ;;  %v744_v61 = vshrl.u32 %v1544_v21, 16 }
  0x33   : > { %1422 = vmatmul.msk.bf16.gmra.mxu1 %vm217_vm1, %v1629_v36  ;;  %1447 = vmatmul.msk.bf16.vlgmr.msrb.gmra.mxu2 %vm217_vm1, %v393_v37  ;;  %v719_v36 = vsel %vm381_vm2, %v714_v29, %v718_v30  ;;  %v1088_v37 = vsel %vm1085_vm3, %v1086_v31, %v1087_v32  ;;  %v864_v29 = vshrl.u32 %v1831_v49, 16  ;;  %v868_v30 = vshll.u32 %v1846_v5, 16  ;;  %v1565_v31 = vld [vmem:[%s1741_s27 + $0x24] sm:$0xf] }
  0x34   : > { %1510 = vmatmul.msk.bf16.gmra.mxu0 %vm217_vm1, %v1646_v38  ;;  %v991_v38 = vsel %vm381_vm2, %v986_v34, %v990_v35 }
  0x35   : > { %1479 = vmatmul.msk.bf16.gmra.mxu3 %vm217_vm1, %v1642_v39  ;;  %v1651_v39 = vld [vmem:[%s1741_s27 + $0x70] sm:$0xff]  ;;  %v870_v41 = vrot.slane %v868_v30, 1 }
  0x36   : > { %v724_v43 = vshll.u32 %v1651_v39, 16  ;;  %v728_v63 = vshrl.u32 %v1651_v39, 16  ;;  %v742_v39 = vrot.slane %v740_v26, 1 }
  0x38   : > { %v726_v51 = vrot.slane %v724_v43, 1  ;;  %v746_v2 = vor.u32 %v744_v61, %v742_v39 }
  0x3a   : > { %v727_v57 = vsel %vm381_vm2, %v722_v50, %v726_v51  ;;  %v730_v6 = vor.u32 %v728_v63, %v726_v51 }
  0x43   : > { %1423 = vmatmul.msk.bf16.gmra.mxu1 %vm217_vm1, %v1630_v45  ;;  %1448 = vmatmul.msk.bf16.gmra.mxu2 %vm217_vm1, %v401_v46  ;;  %v849_v45 = vrot.slane %v847_v40, 1  ;;  %v852_v46 = vshll.u32 %v1654_v28, 16  ;;  %v866_v40 = vor.u32 %v864_v29, %v862_v9 }
  0x44   : > { %1511 = vmatmul.msk.bf16.gmra.mxu0 %vm217_vm1, %v1647_v47  ;;  %v992_v47 = vshrl.u32 %v1659_v18, 16 }
  0x45   : > { %1480 = vmatmul.msk.bf16.gmra.mxu3 %vm217_vm1, %v1643_v48  ;;  %v996_v48 = vshll.u32 %v1660_v42, 16  ;;  %v850_v52 = vor.u32 %v849_v45, %v845_v44  ;;  %v854_v53 = vrot.slane %v852_v46, 1 }
  0x47   : > { %v855_v58 = vsel %vm381_vm2, %v850_v52, %v854_v53 }
  0x53   : > { %1424 = vmatmul.msk.bf16.gmra.mxu1 %vm217_vm1, %v1631_v54  ;;  %1449 = vmatmul.msk.bf16.gmra.mxu2 %vm217_vm1, %v409_v55  ;;  %v1089_v54 = vrot.slane %v1831_v49, 1  ;;  %v994_v55 = vor.u32 %v992_v47, %v990_v35  ;;  %v1008_v35 = vshrl.u32 %v1661_v62, 16 }
  0x54   : > { %1512 = vmatmul.msk.bf16.gmra.mxu0 %vm217_vm1, %v1648_v56  ;;  %v998_v56 = vrot.slane %v996_v48, 1  ;;  %v871_v48 = vsel %vm381_vm2, %v866_v40, %v870_v41 }
  0x55   : > { %1481 = vmatmul.msk.bf16.gmra.mxu3 %vm217_vm1, %v1644_v59  ;;  %v1090_v59 = vsel %vm1085_vm3, %v1087_v32, %v1089_v54  ;;  %v1657_v32 = vld [vmem:[%s1741_s27 + $0x24] sm:$0x10]  ;;  %v1010_v44 = vor.u32 %v1008_v35, %v1006_v12 }
  0x56   : > { %v999_v60 = vsel %vm381_vm2, %v994_v55, %v998_v56 }
  0x63   : > { %1425 = vmatmul.msk.bf16.gmra.mxu1 %vm217_vm1, %v292_v7  ;;  %1450 = vmatmul.msk.bf16.gmra.mxu2 %vm217_vm1, %v417_v8  ;;  %v734_v7 = vrot.slane %v732_v0, 1  ;;  %v858_v8 = vor.u32 %v856_v1, %v854_v53  ;;  %v1016_v1 = vshrl.u32 %v1602_v27, 16 }
  0x64   : > { %1513 = vmatmul.msk.bf16.gmra.mxu0 %vm217_vm1, %v610_v10  ;;  %v1091_v10 = vrot.slane %v1846_v5, 1 }
  0x65   : > { %1482 = vmatmul.msk.bf16.gmra.mxu3 %vm217_vm1, %v515_v11  ;;  %v1002_v11 = vor.u32 %v1000_v3, %v998_v56  ;;  %v735_v14 = vsel %vm381_vm2, %v730_v6, %v734_v7  ;;  %v863_v15 = vsel %vm381_vm2, %v858_v8, %v862_v9  ;;  %v872_v56 = vshrl.u32 %v1846_v5, 16 }
  0x66   : > { %v1092_v19 = vsel %vm1085_vm3, %v1089_v54, %v1091_v10 }
  0x67   : > { %v1007_v20 = vsel %vm381_vm2, %v1002_v11, %v1006_v12  ;;  %v874_v62 = vor.u32 %v872_v56, %v870_v41 }
  0x73   : > { %1451 = vmatmul.msk.bf16.gmra.mxu2 %vm217_vm1, %v420_v33  ;;  %1545 = vmatmul.msk.bf16.vlgmr.msra.gmra.mxu1 %vm217_vm1, %v719_v36  ;;  %v1012_v36 = vshll.u32 %v1602_v27, 16 }
  0x74   : > { %1609 = vmatmul.msk.bf16.vlgmr.msra.gmra.mxu0 %vm217_vm1, %v1088_v37  ;;  %v1566_v37 = vor.u32 %v1657_v32, %v1565_v31 }
  0x75   : > { %1603 = vmatmul.msk.bf16.vlgmr.msra.gmra.mxu3 %vm217_vm1, %v991_v38  ;;  %v738_v38 = vor.u32 %v736_v25, %v734_v7  ;;  %v1014_v45 = vrot.slane %v1012_v36, 1 }
  0x76   : > { %v1093_v42 = vrot.slane %v1566_v37, 1  ;;  %v880_v17 = vshrl.u32 %v1566_v37, 16 }
  0x77   : > { %v743_v47 = vsel %vm381_vm2, %v738_v38, %v742_v39  ;;  %v1015_v53 = vsel %vm381_vm2, %v1010_v44, %v1014_v45  ;;  %v1018_v9 = vor.u32 %v1016_v1, %v1014_v45 }
  0x78   : > { %v1094_v52 = vsel %vm1085_vm3, %v1091_v10, %v1093_v42  ;;  %vm1281_vm3 = vcmask 1040384  }
  0x79   : > { %vm1283_vm6 = vmor %vm1281_vm3, %vm1282_vm5 }
  0x83   : > { %1546 = vmatmul.msk.bf16.gmra.mxu1 %vm217_vm1, %v727_v57  ;;  %1567 = vmatmul.msk.bf16.vlgmr.msra.gmra.mxu2 %vm217_vm1, %v855_v58  ;;  %v876_v57 = vshll.u32 %v1566_v37, 16 }
  0x84   : > { %1610 = vmatmul.msk.bf16.gmra.mxu0 %vm217_vm1, %v1090_v59 }
  0x85   : > { %1604 = vmatmul.msk.bf16.gmra.mxu3 %vm217_vm1, %v999_v60  ;;  %v878_v63 = vrot.slane %v876_v57, 1 }
  0x87   : > { %v879_v4 = vsel %vm381_vm2, %v874_v62, %v878_v63 }
  0x90   : > { %v1849_v13 = vpop.f32.mrf.mxu1 }
  0x91   : > { %v246_v18 = vpop.f32.mrf.mxu0 }
  0x93   : > { %1547 = vmatmul.msk.bf16.gmra.mxu1 %vm217_vm1, %v735_v14  ;;  %1568 = vmatmul.msk.bf16.gmra.mxu2 %vm217_vm1, %v863_v15 }
  0x94   : > { %1611 = vmatmul.msk.bf16.gmra.mxu0 %vm217_vm1, %v1092_v19 }
  0x95   : > { %1605 = vmatmul.msk.bf16.gmra.mxu3 %vm217_vm1, %v1007_v20  ;;  %v882_v20 = vor.u32 %v880_v17, %v878_v63 }
  0x96   : > { %v1862_v24 = vpop.f32.mrf.mxu2 }
  0x98   : > { %v253_v28 = vpop.f32.mrf.mxu1  ;;  %v1869_v33 = vpop.f32.mrf.mxu3 }
  0x99   : > { %v248_v34 = vpop.f32.mrf.mxu0 }
  0x9e   : > { %v258_v43 = vpop.f32.mrf.mxu2 }
  0xa0   : > { %v320_v46 = vpop.f32.mrf.mxu1  ;;  %v268_v50 = vpop.f32.mrf.mxu3 }
  0xa1   : > { %v321_v49 = vadd.f32 %v320_v46, %v246_v18  ;;  %v638_v51 = vpop.f32.mrf.mxu0 }
  0xa3   : > { %1548 = vmatmul.msk.bf16.gmra.mxu1 %vm217_vm1, %v743_v47  ;;  %1569 = vmatmul.msk.bf16.gmra.mxu2 %vm217_vm1, %v871_v48 }
  0xa4   : > { %1612 = vmatmul.msk.bf16.gmra.mxu0 %vm217_vm1, %v1094_v52 }
  0xa5   : > { %1606 = vmatmul.msk.bf16.gmra.mxu3 %vm217_vm1, %v1015_v53 }
  0xa6   : > { %v261_v54 = vpop.f32.mrf.mxu2 }
  0xa8   : > { %v322_v55 = vpop.f32.mrf.mxu1  ;;  %v543_v59 = vpop.f32.mrf.mxu3 }
  0xa9   : > { %v323_v58 = vadd.f32 %v322_v55, %v248_v34  ;;  %v640_v60 = vpop.f32.mrf.mxu0 }
  0xae   : > { %v263_v0 = vpop.f32.mrf.mxu2 }
  0xb0   : > { %v325_v3 = vpop.f32.mrf.mxu1  ;;  %v545_v7 = vpop.f32.mrf.mxu3 }
  0xb1   : > { %v326_v6 = vadd.f32 %v325_v3, %v1849_v13  ;;  %v643_v8 = vpop.f32.mrf.mxu0 }
  0xb3   : > { %1549 = vmatmul.msk.bf16.gmra.mxu1 %vm217_vm1, %v746_v2  ;;  %1570 = vmatmul.msk.bf16.gmra.mxu2 %vm217_vm1, %v879_v4 }
  0xb4   : > { %1613 = vmatmul.msk.bf16.gmra.mxu0 %vm217_vm1, %v1093_v42 }
  0xb5   : > { %1607 = vmatmul.msk.bf16.gmra.mxu3 %vm217_vm1, %v1018_v9 }
  0xb6   : > { %v448_v5 = vpop.f32.mrf.mxu2 }
  0xb7   : > { %v472_v10 = vadd.f32 %v448_v5, %v321_v49 }
  0xb8   : > { %v327_v11 = vpop.f32.mrf.mxu1  ;;  %v548_v15 = vpop.f32.mrf.mxu3 }
  0xb9   : > { %v567_v12 = vadd.f32 %v543_v59, %v472_v10  ;;  %v328_v14 = vadd.f32 %v327_v11, %v253_v28  ;;  %v645_v16 = vpop.f32.mrf.mxu0 }
  0xbb   : > { %v1886_v13 = vadd.f32 %v638_v51, %v567_v12 }
  0xbe   : > { %v450_v18 = vpop.f32.mrf.mxu2 }
  0xbf   : > { %v473_v19 = vadd.f32 %v450_v18, %v323_v58 }
  0xc0   : > { %v330_v21 = vpop.f32.mrf.mxu1  ;;  %v550_v25 = vpop.f32.mrf.mxu3 }
  0xc1   : > { %v568_v22 = vadd.f32 %v545_v7, %v473_v19  ;;  %v331_v23 = vadd.f32 %v330_v21, %v1862_v24  ;;  %v648_v26 = vpop.f32.mrf.mxu0 }
  0xc3   : > { %1571 = vmatmul.msk.bf16.gmra.mxu2 %vm217_vm1, %v882_v20  ;;  %v1890_v27 = vadd.f32 %v640_v60, %v568_v22  ;;  %vm1255_vm1 = vsmask.f32 5392 }
  0xc4   : > { %vm1256_vm2 = vmor %vm1254_vm0, %vm1255_vm1 }
  0xc6   : > { %v453_v29 = vpop.f32.mrf.mxu2 }
  0xc7   : > { %v474_v28 = vadd.f32 %v453_v29, %v326_v6  ;;  %v1911_v29 = vld [vmem:[%s1970_s2] ss:$0 sm:$0xff] }
  0xc8   : > { %v332_v30 = vpop.f32.mrf.mxu1  ;;  %v553_v34 = vpop.f32.mrf.mxu3 }
  0xc9   : > { %v569_v31 = vadd.f32 %v548_v15, %v474_v28  ;;  %v333_v32 = vadd.f32 %v332_v30, %v258_v43  ;;  %v650_v35 = vpop.f32.mrf.mxu0 }
  0xcb   : > { %v1892_v36 = vadd.f32 %v643_v8, %v569_v31 }
  0xce   : > { %v455_v37 = vpop.f32.mrf.mxu2 }
  0xcf   : > { %v475_v38 = vadd.f32 %v455_v37, %v328_v14 }
  0xd0   : > { %v335_v39 = vpop.f32.mrf.mxu1  ;;  %v555_v41 = vpop.f32.mrf.mxu3 }
  0xd1   : > { %v570_v40 = vadd.f32 %v550_v25, %v475_v38  ;;  %v336_v24 = vadd.f32 %v335_v39, %v261_v54  ;;  %v653_v42 = vpop.f32.mrf.mxu0 }
  0xd3   : > { %v1894_v44 = vadd.f32 %v645_v16, %v570_v40 }
  0xd6   : > { %v458_v45 = vpop.f32.mrf.mxu2 }
  0xd7   : > { %v476_v46 = vadd.f32 %v458_v45, %v331_v23 }
  0xd8   : > { %v337_v47 = vpop.f32.mrf.mxu1  ;;  %v558_v50 = vpop.f32.mrf.mxu3 }
  0xd9   : > { %v571_v48 = vadd.f32 %v553_v34, %v476_v46  ;;  %v338_v49 = vadd.f32 %v337_v47, %v263_v0  ;;  %v655_v43 = vpop.f32.mrf.mxu0 }
  0xdb   : > { %v1896_v51 = vadd.f32 %v648_v26, %v571_v48 }
  0xde   : > { %v460_v52 = vpop.f32.mrf.mxu2 }
  0xdf   : > { %v477_v53 = vadd.f32 %v460_v52, %v333_v32 }
  0xe0   : > { %v340_v55 = vpop.f32.mrf.mxu1  ;;  %v560_v54 = vpop.f32.mrf.mxu3 }
  0xe1   : > { %v572_v56 = vadd.f32 %v555_v41, %v477_v53  ;;  %v341_v57 = vadd.f32 %v340_v55, %v1869_v33  ;;  %v658_v58 = vpop.f32.mrf.mxu0 }
  0xe3   : > { %v1899_v59 = vadd.f32 %v650_v35, %v572_v56 }
  0xe6   : > { %v463_v60 = vpop.f32.mrf.mxu2 }
  0xe7   : > { %v478_v61 = vadd.f32 %v463_v60, %v336_v24 }
  0xe8   : > { %v342_v62 = vpop.f32.mrf.mxu1  ;;  %v563_v1 = vpop.f32.mrf.mxu3 }
  0xe9   : > { %v573_v63 = vadd.f32 %v558_v50, %v478_v61  ;;  %v660_v0 = vpop.f32.mrf.mxu0 }
  0xeb   : > { %v1901_v2 = vadd.f32 %v653_v42, %v573_v63 }
  0xee   : > { %v465_v3 = vpop.f32.mrf.mxu2 }
  0xef   : > { %v479_v4 = vadd.f32 %v465_v3, %v338_v49 }
  0xf0   : > { %v774_v6 = vpop.f32.mrf.mxu1  ;;  %v565_v8 = vpop.f32.mrf.mxu3 }
  0xf1   : > { %v574_v7 = vadd.f32 %v560_v54, %v479_v4  ;;  %v1122_v9 = vpop.f32.mrf.mxu0  ;;  %v798_v21 = vadd.f32 %v774_v6, %v1886_v13 }
  0xf3   : > { %v1903_v5 = vadd.f32 %v655_v43, %v574_v7 }
  0xf6   : > { %v468_v33 = vpop.f32.mrf.mxu2 }
  0xf7   : > { %v480_v10 = vadd.f32 %v468_v33, %v341_v57 }
  0xf8   : > { %v776_v11 = vpop.f32.mrf.mxu1  ;;  %v1046_v14 = vpop.f32.mrf.mxu3 }
  0xf9   : > { %v575_v12 = vadd.f32 %v563_v1, %v480_v10  ;;  %v1124_v15 = vpop.f32.mrf.mxu0  ;;  %v799_v32 = vadd.f32 %v776_v11, %v1890_v27 }
  0xfb   : > { %v1905_v16 = vadd.f32 %v658_v58, %v575_v12 }
  0xfe   : > { %v470_v17 = vpop.f32.mrf.mxu2 }
 0x100   : > { %v779_v18 = vpop.f32.mrf.mxu1  ;;  %v1048_v19 = vpop.f32.mrf.mxu3 }
 0x101   : > { %v1127_v20 = vpop.f32.mrf.mxu0  ;;  %v800_v42 = vadd.f32 %v779_v18, %v1892_v36 }
 0x106   : > { %v910_v22 = vpop.f32.mrf.mxu2 }
 0x107   : > { %v934_v23 = vadd.f32 %v910_v22, %v798_v21 }
 0x108   : > { %v781_v25 = vpop.f32.mrf.mxu1  ;;  %v1051_v28 = vpop.f32.mrf.mxu3 }
 0x109   : > { %v1070_v26 = vadd.f32 %v1046_v14, %v934_v23  ;;  %v1129_v30 = vpop.f32.mrf.mxu0  ;;  %v801_v54 = vadd.f32 %v781_v25, %v1894_v44 }
 0x10b   : > { %v1146_v31 = vadd.f32 %v1122_v9, %v1070_v26 }
 0x10d   : > { %v1159_v34 = vadd.f32 %v1911_v29, %v1146_v31 }
 0x10e   : > { %v912_v35 = vpop.f32.mrf.mxu2 }
 0x10f   : > { %v1168_v37 = vmax.f32 %v1159_v34, 0.0  ;;  %v935_v13 = vadd.f32 %v912_v35, %v799_v32 }
 0x110   : > { %v784_v38 = vpop.f32.mrf.mxu1  ;;  %v1053_v24 = vpop.f32.mrf.mxu3 }
 0x111   : > { %v1177_v39 = vpack.c.bf16 %v1168_v37, %v1168_v37  ;;  %v1071_v40 = vadd.f32 %v1048_v19, %v935_v13  ;;  %v1132_v41 = vpop.f32.mrf.mxu0  ;;  %v802_v33 = vadd.f32 %v784_v38, %v1896_v51 }
 0x113   : > { %1179 = vst.msk [vmem:[%s1919_s16] sm:$0xf] %vm1178_vm4, %v1177_v39  ;;  %v1147_v27 = vadd.f32 %v1124_v15, %v1071_v40 }
 0x115   : > { %v1160_v45 = vadd.f32 %v1911_v29, %v1147_v27 }
 0x116   : > { %v915_v46 = vpop.f32.mrf.mxu2 }
 0x117   : > { %v1169_v47 = vmax.f32 %v1160_v45, 0.0  ;;  %v936_v48 = vadd.f32 %v915_v46, %v800_v42 }
 0x118   : > { %v786_v49 = vpop.f32.mrf.mxu1  ;;  %v1056_v52 = vpop.f32.mrf.mxu3 }
 0x119   : > { %v1180_v50 = vpack.c.bf16 %v1169_v47, %v1169_v47  ;;  %v1072_v43 = vadd.f32 %v1051_v28, %v936_v48  ;;  %v1925_v53 = vpop.f32.mrf.mxu0 }
 0x11b   : > { %v1186_v55 = vshrl.u32 %v1180_v50, 16  ;;  %v1189_v56 = vshll.u32 %v1180_v50, 16  ;;  %v1148_v57 = vadd.f32 %v1127_v20, %v1072_v43 }
 0x11d   : > { %v1188_v58 = vrot.slane %v1186_v55, 4  ;;  %v1191_v60 = vrot.slane %v1189_v56, 5  ;;  %v1161_v36 = vadd.f32 %v1911_v29, %v1148_v57 }
 0x11e   : > { %v917_v61 = vpop.f32.mrf.mxu2 }
 0x11f   : > { %v1170_v62 = vmax.f32 %v1161_v36, 0.0  ;;  %v937_v63 = vadd.f32 %v917_v61, %v801_v54  ;;  %v1192_v0 = vor.u32 %v1191_v60, %v1188_v58 }
 0x120   : > { %v789_v1 = vpop.f32.mrf.mxu1  ;;  %v1058_v6 = vpop.f32.mrf.mxu3 }
 0x121   : > { %v1181_v3 = vpack.c.bf16 %v1170_v62, %v1170_v62  ;;  %v1073_v4 = vadd.f32 %v1053_v24, %v937_v63  ;;  %v1929_v7 = vpop.f32.mrf.mxu0  ;;  %v1193_v44 = vrot.slane %v1192_v0, 4  ;;  %v804_v47 = vadd.f32 %v789_v1, %v1901_v2 }
 0x123   : > { %v1195_v8 = vshll.u32 %v1181_v3, 16  ;;  %v1149_v9 = vadd.f32 %v1129_v30, %v1073_v4  ;;  %v1615_v23 = vrot.slane %v1181_v3, 9  ;;  %v803_v30 = vadd.f32 %v786_v49, %v1899_v59 }
 0x125   : > { %v1197_v10 = vrot.slane %v1195_v8, 5  ;;  %v1162_v11 = vadd.f32 %v1911_v29, %v1149_v9 }
 0x126   : > { %v920_v12 = vpop.f32.mrf.mxu2 }
 0x127   : > { %v1198_v14 = vsel %vm1184_vm7, %v1193_v44, %v1197_v10  ;;  %v1171_v15 = vmax.f32 %v1162_v11, 0.0  ;;  %v938_v17 = vadd.f32 %v920_v12, %v802_v33  ;;  %vm1292_vm7 = vsmask.f32 256 }
 0x128   : > { %1614 = vst.msk [vmem:[%s1919_s16 + $0x4] sm:$0xf] %vm1178_vm4, %v1198_v14  ;;  %v791_v18 = vpop.f32.mrf.mxu1  ;;  %v1061_v21 = vpop.f32.mrf.mxu3  ;;  %vm1294_vm9 = vmor %vm1292_vm7, %vm1293_vm8 }
 0x129   : > { %v1202_v19 = vpack.c.bf16 %v1171_v15, %v1171_v15  ;;  %v1074_v20 = vadd.f32 %v1056_v52, %v938_v17  ;;  %v1935_v22 = vpop.f32.mrf.mxu0  ;;  %v805_v3 = vadd.f32 %v791_v18, %v1903_v5 }
 0x12b   : > { %v1210_v51 = vrot.slane %v1202_v19, 5  ;;  %v1220_v25 = vshrl.u32 %v1202_v19, 16  ;;  %v1223_v26 = vshll.u32 %v1202_v19, 16  ;;  %v1150_v28 = vadd.f32 %v1132_v41, %v1074_v20 }
 0x12d   : > { %v1211_v31 = vsel %vm1207_vm10, %v1615_v23, %v1210_v51  ;;  %v1163_v32 = vadd.f32 %v1911_v29, %v1150_v28  ;;  %v1222_v35 = vrot.slane %v1220_v25, 5  ;;  %v1225_v37 = vrot.slane %v1223_v26, 6 }
 0x12e   : > { %1616 = vst.msk [vmem:[%s1919_s16 + $0x8] sm:$0xf] %vm1178_vm4, %v1211_v31  ;;  %v922_v34 = vpop.f32.mrf.mxu2 }
 0x12f   : > { %v1172_v13 = vmax.f32 %v1163_v32, 0.0  ;;  %v939_v38 = vadd.f32 %v922_v34, %v803_v30  ;;  %v1226_v41 = vor.u32 %v1225_v37, %v1222_v35 }
 0x130   : > { %v794_v39 = vpop.f32.mrf.mxu1  ;;  %v1063_v27 = vpop.f32.mrf.mxu3 }
 0x131   : > { %v1215_v40 = vpack.c.bf16 %v1172_v13, %v1172_v13  ;;  %v1075_v24 = vadd.f32 %v1058_v6, %v939_v38  ;;  %v1941_v42 = vpop.f32.mrf.mxu0  ;;  %v1227_v52 = vrot.slane %v1226_v41, 4  ;;  %v806_v18 = vadd.f32 %v794_v39, %v1905_v16 }
 0x133   : > { %v1229_v59 = vshrl.u32 %v1215_v40, 16  ;;  %v1232_v45 = vshll.u32 %v1215_v40, 16  ;;  %v1151_v46 = vadd.f32 %v1925_v53, %v1075_v24  ;;  %v1618_v2 = vrot.slane %v1215_v40, 10 }
 0x135   : > { %v1231_v48 = vrot.slane %v1229_v59, 5  ;;  %v1234_v49 = vrot.slane %v1232_v45, 6  ;;  %v1164_v50 = vadd.f32 %v1911_v29, %v1151_v46 }
 0x136   : > { %v925_v43 = vpop.f32.mrf.mxu2 }
 0x137   : > { %v1235_v55 = vor.u32 %v1234_v49, %v1231_v48  ;;  %v1173_v56 = vmax.f32 %v1164_v50, 0.0  ;;  %v940_v57 = vadd.f32 %v925_v43, %v804_v47 }
 0x138   : > { %v796_v54 = vpop.f32.mrf.mxu1  ;;  %v1066_v53 = vpop.f32.mrf.mxu3 }
 0x139   : > { %v1236_v58 = vsel %vm1218_vm13, %v1227_v52, %v1235_v55  ;;  %v1240_v60 = vpack.c.bf16 %v1173_v56, %v1173_v56  ;;  %v1076_v36 = vadd.f32 %v1061_v21, %v940_v57  ;;  %v1144_v61 = vpop.f32.mrf.mxu0 }
 0x13a   : > { %1617 = vst.msk [vmem:[%s1919_s16 + $0xc] sm:$0xf] %vm1178_vm4, %v1236_v58 }
 0x13b   : > { %v1248_v62 = vrot.slane %v1240_v60, 6  ;;  %v1258_v63 = vshrl.u32 %v1240_v60, 16  ;;  %v1261_v1 = vshll.u32 %v1240_v60, 16  ;;  %v1152_v0 = vadd.f32 %v1929_v7, %v1076_v36 }
 0x13d   : > { %v1249_v4 = vsel %vm1245_vm15, %v1618_v2, %v1248_v62  ;;  %v1165_v6 = vadd.f32 %v1911_v29, %v1152_v0  ;;  %v1260_v9 = vrot.slane %v1258_v63, 6  ;;  %v1263_v44 = vrot.slane %v1261_v1, 7 }
 0x13e   : > { %1619 = vst.msk [vmem:[%s1919_s16 + $0x10] sm:$0xf] %vm1178_vm4, %v1249_v4  ;;  %v927_v8 = vpop.f32.mrf.mxu2 }
 0x13f   : > { %v1174_v33 = vmax.f32 %v1165_v6, 0.0  ;;  %v941_v10 = vadd.f32 %v927_v8, %v805_v3  ;;  %v1264_v15 = vor.u32 %v1263_v44, %v1260_v9 }
 0x140   : > { %v1068_v14 = vpop.f32.mrf.mxu3 }
 0x141   : > { %v1253_v11 = vpack.c.bf16 %v1174_v33, %v1174_v33  ;;  %v1077_v12 = vadd.f32 %v1063_v27, %v941_v10  ;;  %v1265_v51 = vrot.slane %v1264_v15, 4 }
 0x143   : > { %v1267_v17 = vshrl.u32 %v1253_v11, 16  ;;  %v1270_v7 = vshll.u32 %v1253_v11, 16  ;;  %v1153_v5 = vadd.f32 %v1935_v22, %v1077_v12  ;;  %v1621_v16 = vrot.slane %v1253_v11, 11 }
 0x145   : > { %v1269_v19 = vrot.slane %v1267_v17, 6  ;;  %v1272_v20 = vrot.slane %v1270_v7, 7  ;;  %v1166_v21 = vadd.f32 %v1911_v29, %v1153_v5 }
 0x146   : > { %v930_v23 = vpop.f32.mrf.mxu2 }
 0x147   : > { %v1273_v25 = vor.u32 %v1272_v20, %v1269_v19  ;;  %v1175_v26 = vmax.f32 %v1166_v21, 0.0  ;;  %v942_v28 = vadd.f32 %v930_v23, %v806_v18 }
 0x149   : > { %v1274_v30 = vsel %vm1256_vm2, %v1265_v51, %v1273_v25  ;;  %v1278_v31 = vpack.c.bf16 %v1175_v26, %v1175_v26  ;;  %v1078_v32 = vadd.f32 %v1066_v53, %v942_v28 }
 0x14a   : > { %1620 = vst.msk [vmem:[%s1919_s16 + $0x14] sm:$0xf] %vm1178_vm4, %v1274_v30 }
 0x14b   : > { %v1286_v22 = vrot.slane %v1278_v31, 7  ;;  %v1154_v34 = vadd.f32 %v1941_v42, %v1078_v32  ;;  %v1296_v40 = vshrl.u32 %v1278_v31, 16 }
 0x14d   : > { %v1287_v35 = vsel %vm1283_vm6, %v1621_v16, %v1286_v22  ;;  %v1167_v37 = vadd.f32 %v1911_v29, %v1154_v34  ;;  %v1623_v59 = vrot.slane %v1296_v40, 11 }
 0x14e   : > { %1622 = vst.msk [vmem:[%s1919_s16 + $0x18] sm:$0xf] %vm1178_vm4, %v1287_v35  ;;  %v932_v13 = vpop.f32.mrf.mxu2 }
 0x14f   : > { %v1176_v38 = vmax.f32 %v1167_v37, 0.0 }
 0x151   : > { %v1291_v39 = vpack.c.bf16 %v1176_v38, %v1176_v38 }
 0x153   : > { %v1301_v24 = vshrl.u32 %v1291_v39, 16  ;;  %v1304_v41 = vshll.u32 %v1291_v39, 16 }
 0x155   : > { %v1303_v27 = vrot.slane %v1301_v24, 7 }
 0x157   : > { %v1306_v45 = vor.u32 %v1304_v41, %v1303_v27 }
 0x159   : > { %v1307_v46 = vsel %vm1294_vm9, %v1623_v59, %v1306_v45 }
 0x15a   : > { %1624 = vst.msk [vmem:[%s1919_s16 + $0x1c] sm:$0xf] %vm1178_vm4, %v1307_v46 }
 0x15b PF: > { %s13_s12 = sadd.s32 1, %s1685_s12  }
 0x15c   : > { %p10_p4 = scmp.ge.s32.totalorder %s13_s12, 4  }
 0x15e   :  { %12 = sbr.rel (!%p10_p4) target bundleno = 1 (0x1), region = 80 }

</bundles_post_ra>
